<compile_context>
chip_gen: v7x
topology: tpu7x:2x2x1
jax: 0.10.0
libtpu: 0.0.40
codegen_flags: <defaults>
</compile_context>

<pallas_src>
import functools

import jax
import jax.numpy as jnp
from jax.experimental import pallas as pl
from jax.experimental.pallas import tpu as pltpu


_WH = 128  # halo width per side (one lane-aligned block); must cover the total receptive radius


def _cdiv(a, b):
    return -(-a // b)


# ----------------------------------------------------------------------------
# Fused per-flow Pallas kernel
# ----------------------------------------------------------------------------

@functools.lru_cache(maxsize=None)
def _flow_fn(B, half, H, K, dr, n_layers, Tp, tT):
    Wh = _WH
    W0 = tT + 2 * Wh
    r = tT // Wh                    # halo blocks per time tile
    nblk = Tp // Wh                 # total halo-width blocks along padded time
    nT = Tp // tT
    C2 = 2 * H

    pads = [((K - 1) * (dr ** i)) // 2 for i in range(n_layers)]
    assert sum(pads) <= Wh, "total dilated receptive radius must fit within one halo block"

    def kernel(x0l_ref, x0c_ref, x0r_ref, ml_ref, mc_ref, mr_ref, x1_ref, gb_ref,
               prew_ref, preb_ref, inw_ref, rsw_ref, rsb_ref, postw_ref, postb_ref,
               o_ref):
        j = pl.program_id(1)
        lval = (j > 0).astype(jnp.float32)        # zero the left halo at the first tile
        rval = (j < nT - 1).astype(jnp.float32)   # zero the right halo at the last tile

        mc = mc_ref[...]                                                   # (1, tT)
        mw = jnp.concatenate([ml_ref[...] * lval, mc, mr_ref[...] * rval],
                             axis=-1)                                      # (1, W0)
        x0w = jnp.concatenate([x0l_ref[...], x0c_ref[...], x0r_ref[...]],
                              axis=-1).astype(jnp.bfloat16)                # (half, W0)

        # pre: 1x1 conv + bias, masked -> hidden state over the haloed window.
        # Out-of-range halo columns have mask==0 -> h==0 there == conv "same" zero padding.
        h = jax.lax.dot_general(prew_ref[...], x0w, (((1,), (0,)), ((), ())),
                                preferred_element_type=jnp.float32)
        h = (h + preb_ref[...]) * mw                                       # (H, W0) f32

        skip = jnp.zeros((H, tT), jnp.float32)
        m_off = 0
        w_cur = W0
        for i in range(n_layers):                       # static unroll over WN layers
            d = dr ** i
            p = pads[i]
            w_out = w_cur - 2 * p                       # "valid" window shrinks by pad per side
            hb = h.astype(jnp.bfloat16)
            s = None
            for k in range(K):                          # dilated conv = K shifted 1x1 matmuls
                xk = hb[:, k * d:k * d + w_out]         # static lane slice
                dd = jax.lax.dot_general(inw_ref[i, k], xk, (((1,), (0,)), ((), ())),
                                         preferred_element_type=jnp.float32)
                s = dd if s is None else s + dd
            s = s + gb_ref[i]                           # conv bias + cond `g`, (2H,1) broadcast
            acts = jnp.tanh(s[:H]) * jax.nn.sigmoid(s[H:])                 # (H, w_out)
            rs = jax.lax.dot_general(rsw_ref[i], acts.astype(jnp.bfloat16),
                                     (((1,), (0,)), ((), ())),
                                     preferred_element_type=jnp.float32) + rsb_ref[i]
            m_off += p
            c0 = Wh - m_off                             # central tile offset in this window
            skip = skip + rs[H:, c0:c0 + tT]
            if i < n_layers - 1:
                h = (h[:, p:p + w_out] + rs[:H]) * mw[:, m_off:m_off + w_out]
            w_cur = w_out

        out_wn = skip * mc                                                 # (H, tT)
        y = jax.lax.dot_general(postw_ref[...], out_wn.astype(jnp.bfloat16),
                                (((1,), (0,)), ((), ())),
                                preferred_element_type=jnp.float32) + postb_ref[...]
        o_ref[...] = (y + x1_ref[...]) * mc

    def left_idx(b, j):
        return (b, 0, jnp.maximum(j * r - 1, 0))

    def right_idx(b, j):
        return (b, 0, jnp.minimum(j * r + r, nblk - 1))

    in_specs = [
        pl.BlockSpec((None, half, Wh), left_idx),                    # x0 left halo
        pl.BlockSpec((None, half, tT), lambda b, j: (b, 0, j)),      # x0 current tile
        pl.BlockSpec((None, half, Wh), right_idx),                   # x0 right halo
        pl.BlockSpec((None, 1, Wh), left_idx),                       # mask left halo
        pl.BlockSpec((None, 1, tT), lambda b, j: (b, 0, j)),         # mask current
        pl.BlockSpec((None, 1, Wh), right_idx),                      # mask right halo
        pl.BlockSpec((None, half, tT), lambda b, j: (b, 0, j)),      # x1 current
        pl.BlockSpec((None, n_layers, C2, 1), lambda b, j: (b, 0, 0, 0)),   # bias + cond
        pl.BlockSpec((H, half), lambda b, j: (0, 0)),                # pre weight (bf16)
        pl.BlockSpec((H, 1), lambda b, j: (0, 0)),                   # pre bias
        pl.BlockSpec((n_layers, K, C2, H), lambda b, j: (0, 0, 0, 0)),      # in_layer weights
        pl.BlockSpec((n_layers, C2, H), lambda b, j: (0, 0, 0)),     # res_skip weights
        pl.BlockSpec((n_layers, C2, 1), lambda b, j: (0, 0, 0)),     # res_skip biases
        pl.BlockSpec((half, H), lambda b, j: (0, 0)),                # post weight (bf16)
        pl.BlockSpec((half, 1), lambda b, j: (0, 0)),                # post bias
    ]

    return pl.pallas_call(
        kernel,
        out_shape=jax.ShapeDtypeStruct((B, half, Tp), jnp.float32),
        grid=(B, nT),
        in_specs=in_specs,
        out_specs=pl.BlockSpec((None, half, tT), lambda b, j: (b, 0, j)),
        compiler_params=pltpu.CompilerParams(
            dimension_semantics=("parallel", "parallel")),
    )


# ----------------------------------------------------------------------------
# Wrapper: weight prep (bf16 cast, Flip folding) + flow loop
# ----------------------------------------------------------------------------

def _prep_flow_weights(cp, H, n_layers, rev0, rev1, B, g):
    wn = cp["wn"]

    pw = cp["pre"]["w"][:, :, 0]
    if rev0:                                        # fold Flip's channel reversal of x0 into pre
        pw = pw[:, ::-1]
    prew = pw.astype(jnp.bfloat16)
    preb = cp["pre"]["b"][:, None]

    inw = jnp.stack([wn["in"][i]["w"].transpose(2, 0, 1)
                     for i in range(n_layers)]).astype(jnp.bfloat16)        # (L, K, 2H, H)
    inb = jnp.stack([wn["in"][i]["b"] for i in range(n_layers)])[..., None]  # (L, 2H, 1)

    rs_w, rs_b = [], []
    for i in range(n_layers):
        w = wn["rs"][i]["w"][:, :, 0]
        b = wn["rs"][i]["b"]
        if i == n_layers - 1:       # last layer is skip-only: pad unused res half with zeros
            w = jnp.concatenate([jnp.zeros((H, H), w.dtype), w], axis=0)
            b = jnp.concatenate([jnp.zeros((H,), b.dtype), b], axis=0)
        rs_w.append(w)
        rs_b.append(b)
    rsw = jnp.stack(rs_w).astype(jnp.bfloat16)      # (L, 2H, H)
    rsb = jnp.stack(rs_b)[..., None]                # (L, 2H, 1)

    if g is not None and wn["cond"] is not None:
        g_all = (jnp.einsum("oc,bct->bot", wn["cond"]["w"][:, :, 0], g)
                 + wn["cond"]["b"][None, :, None])                  # (B, 2H*L, 1)
        gb = g_all.reshape(B, n_layers, 2 * H, 1) + inb[None]
    else:
        gb = jnp.broadcast_to(inb[None], (B, n_layers, 2 * H, 1))

    qw = cp["post"]["w"][:, :, 0]
    qb = cp["post"]["b"]
    if rev1:                        # fold Flip's channel reversal of x1 into post outputs
        qw = qw[::-1, :]
        qb = qb[::-1]
    postw = qw.astype(jnp.bfloat16)
    postb = qb[:, None]
    return prew, preb, inw, gb, rsw, rsb, postw, postb


def residual_coupling_block_forward(params, x, x_mask, g, *, cfg):
    """ResidualCouplingBlock.forward (reverse=False): [CouplingLayer, Flip] * n_flows."""
    B, C, T = x.shape
    half = C // 2
    H, K, dr, n_layers = (cfg["hidden_channels"], cfg["kernel_size"],
                          cfg["dilation_rate"], cfg["n_layers"])

    # lane-dense time tiling: tiles <= ~1024, multiple of 128
    nT = _cdiv(T, 1024)
    tT = _cdiv(_cdiv(T, nT), _WH) * _WH
    Tp = nT * tT

    pad = ((0, 0), (0, 0), (0, Tp - T))
    x0 = jnp.pad(x[:, :half], pad)
    x1 = jnp.pad(x[:, half:], pad)
    m = jnp.pad(x_mask, pad)

    fn = _flow_fn(B, half, H, K, dr, n_layers, Tp, tT)

    rev0 = rev1 = False             # per-half "channels reversed" flags (Flip bookkeeping)
    for cp in params["flows"]:
        prew, preb, inw, gb, rsw, rsb, postw, postb = _prep_flow_weights(
            cp, H, n_layers, rev0, rev1, B, g)
        x1_new = fn(x0, x0, x0, m, m, m, x1, gb,
                    prew, preb, inw, rsw, rsb, postw, postb)
        # modules.Flip (forward): swap halves + reverse channels within each half.
        # Implemented as a reference swap + flag toggle; actual reversal was folded into weights.
        x0, x1 = x1_new, x0
        rev0, rev1 = (not rev1), (not rev0)

    a = jnp.flip(x0, axis=1) if rev0 else x0
    b = jnp.flip(x1, axis=1) if rev1 else x1
    return jnp.concatenate([a, b], axis=1)[:, :, :T]


# ----------------------------------------------------------------------------
# Parameters
# ----------------------------------------------------------------------------

class _PInit:
    def __init__(self, key):
        self._key, self._n = key, 0

    def __call__(self, shape, scale=0.1):
        self._n += 1
        return scale * jax.random.normal(jax.random.fold_in(self._key, self._n),
                                         shape, jnp.float32)


def _conv_p(p, cin, cout, k, scale=0.1):
    return {"w": p((cout, cin, k), scale), "b": jnp.zeros((cout,), jnp.float32)}


def build_params(key, cfg):
    p = _PInit(key)
    half = cfg["channels"] // 2
    H, K, n_layers, gin = (cfg["hidden_channels"], cfg["kernel_size"],
                           cfg["n_layers"], cfg["gin_channels"])
    flows = []
    for _ in range(cfg["n_flows"]):
        wn = {
            "in": [_conv_p(p, H, 2 * H, K) for _ in range(n_layers)],
            "rs": [_conv_p(p, H, 2 * H if i < n_layers - 1 else H, 1)
                   for i in range(n_layers)],
            "cond": _conv_p(p, gin, 2 * H * n_layers, 1) if gin > 0 else None,
        }
        flows.append({
            "pre": _conv_p(p, half, H, 1),
            "wn": wn,
            "post": _conv_p(p, H, half, 1),   # PyTorch zero-inits; random to exercise compute
        })
    return {"flows": flows}


# ----------------------------------------------------------------------------
# Pure-JAX reference (mirrors the PyTorch module) for a numerical check
# ----------------------------------------------------------------------------

def _ref_conv1d(x, w, b, dilation=1, padding=0):
    y = jax.lax.conv_general_dilated(
        x, w, window_strides=(1,), padding=[(padding, padding)],
        rhs_dilation=(dilation,), dimension_numbers=("NCH", "OIH", "NCH"))
    return y + b[None, :, None]


def _ref_wn(wp, x, x_mask, g, cfg):
    H, K, dr, n = (cfg["hidden_channels"], cfg["kernel_size"],
                   cfg["dilation_rate"], cfg["n_layers"])
    out = jnp.zeros_like(x)
    if g is not None:
        g = _ref_conv1d(g, wp["cond"]["w"], wp["cond"]["b"])
    for i in range(n):
        d = dr ** i
        pad = (K * d - d) // 2
        x_in = _ref_conv1d(x, wp["in"][i]["w"], wp["in"][i]["b"], dilation=d, padding=pad)
        g_l = g[:, i * 2 * H:(i + 1) * 2 * H] if g is not None else 0.0
        s = x_in + g_l
        acts = jnp.tanh(s[:, :H]) * jax.nn.sigmoid(s[:, H:])
        rs = _ref_conv1d(acts, wp["rs"][i]["w"], wp["rs"][i]["b"])
        if i < n - 1:
            x = (x + rs[:, :H]) * x_mask
            out = out + rs[:, H:]
        else:
            out = out + rs
    return out * x_mask


def _ref_block(params, x, x_mask, g, cfg):
    half = cfg["channels"] // 2
    for cp in params["flows"]:
        x0, x1 = x[:, :half], x[:, half:]
        h = _ref_conv1d(x0, cp["pre"]["w"], cp["pre"]["b"]) * x_mask
        h = _ref_wn(cp["wn"], h, x_mask, g, cfg)
        m = _ref_conv1d(h, cp["post"]["w"], cp["post"]["b"]) * x_mask
        x1 = m + x1 * x_mask
        x = jnp.concatenate([x0, x1], axis=1)
        x = jnp.flip(x, axis=1)
    return x


# ----------------------------------------------------------------------------

if __name__ == "__main__":
    cfg = dict(channels=8, hidden_channels=16, kernel_size=5, dilation_rate=1,
               n_layers=4, n_flows=4, gin_channels=8)

    key = jax.random.PRNGKey(0)
    k_param, k_x, k_g = jax.random.split(key, 3)
    params = build_params(k_param, cfg)

    B, T = 2, 64
    x = jax.random.normal(k_x, (B, cfg["channels"], T), jnp.float32)
    lengths = jnp.array([T, 48], jnp.int32)
    x_mask = (jnp.arange(T)[None, :] < lengths[:, None]).astype(jnp.float32)[:, None, :]
    g = jax.random.normal(k_g, (B, cfg["gin_channels"], 1), jnp.float32)

    fwd = jax.jit(functools.partial(residual_coupling_block_forward, cfg=cfg))
    y = jax.block_until_ready(fwd(params, x, x_mask, g))

    y_ref = _ref_block(params, x, x_mask, g, cfg)
    assert y.shape == x.shape
    assert bool(jnp.all(jnp.isfinite(y)))
    max_err = float(jnp.max(jnp.abs(y - y_ref)))
    assert max_err < 5e-2, f"mismatch vs reference: {max_err}"
    print("KERNEL_OK")
</pallas_src>

<mosaic_0001>
module attributes {stable_mosaic.version = 11 : i64} {
  func.func @kernel(%arg0: i32, %arg1: i32, %arg2: memref<1x4x128xf32, #tpu.memory_space<vmem>>, %arg3: memref<1x4x128xf32, #tpu.memory_space<vmem>>, %arg4: memref<1x4x128xf32, #tpu.memory_space<vmem>>, %arg5: memref<1x1x128xf32, #tpu.memory_space<vmem>>, %arg6: memref<1x1x128xf32, #tpu.memory_space<vmem>>, %arg7: memref<1x1x128xf32, #tpu.memory_space<vmem>>, %arg8: memref<1x4x128xf32, #tpu.memory_space<vmem>>, %arg9: memref<1x4x32x1xf32, #tpu.memory_space<vmem>>, %arg10: memref<16x4xbf16, #tpu.memory_space<vmem>>, %arg11: memref<16x1xf32, #tpu.memory_space<vmem>>, %arg12: memref<4x5x32x16xbf16, #tpu.memory_space<vmem>>, %arg13: memref<4x32x16xbf16, #tpu.memory_space<vmem>>, %arg14: memref<4x32x1xf32, #tpu.memory_space<vmem>>, %arg15: memref<4x16xbf16, #tpu.memory_space<vmem>>, %arg16: memref<4x1xf32, #tpu.memory_space<vmem>>, %arg17: memref<1x4x128xf32, #tpu.memory_space<vmem>>) attributes {dimension_semantics = [#tpu.dimension_semantics<parallel>, #tpu.dimension_semantics<parallel>], iteration_bounds = array<i64: 2, 1>, scalar_prefetch = 0 : i64, scratch_operands = 0 : i64, tpu.core_type = #tpu.core_type<tc>, window_params = [{transform_indices = @transform_0, window_bounds = array<i64: 1, 4, 128>}, {transform_indices = @transform_1, window_bounds = array<i64: 1, 4, 128>}, {transform_indices = @transform_2, window_bounds = array<i64: 1, 4, 128>}, {transform_indices = @transform_3, window_bounds = array<i64: 1, 1, 128>}, {transform_indices = @transform_4, window_bounds = array<i64: 1, 1, 128>}, {transform_indices = @transform_5, window_bounds = array<i64: 1, 1, 128>}, {transform_indices = @transform_6, window_bounds = array<i64: 1, 4, 128>}, {transform_indices = @transform_7, window_bounds = array<i64: 1, 4, 32, 1>}, {pipeline_mode = #tpu.pipeline_mode<synchronous>, transform_indices = @transform_8, window_bounds = array<i64: 16, 4>}, {pipeline_mode = #tpu.pipeline_mode<synchronous>, transform_indices = @transform_9, window_bounds = array<i64: 16, 1>}, {pipeline_mode = #tpu.pipeline_mode<synchronous>, transform_indices = @transform_10, window_bounds = array<i64: 4, 5, 32, 16>}, {pipeline_mode = #tpu.pipeline_mode<synchronous>, transform_indices = @transform_11, window_bounds = array<i64: 4, 32, 16>}, {pipeline_mode = #tpu.pipeline_mode<synchronous>, transform_indices = @transform_12, window_bounds = array<i64: 4, 32, 1>}, {pipeline_mode = #tpu.pipeline_mode<synchronous>, transform_indices = @transform_13, window_bounds = array<i64: 4, 16>}, {pipeline_mode = #tpu.pipeline_mode<synchronous>, transform_indices = @transform_14, window_bounds = array<i64: 4, 1>}, {transform_indices = @transform_15, window_bounds = array<i64: 1, 4, 128>}]} {
    %c0_i32 = arith.constant 0 : i32
    %0 = arith.cmpi sgt, %arg1, %c0_i32 : i32
    %1 = arith.extui %0 : i1 to i32
    %2 = arith.sitofp %1 : i32 to f32
    %c0_i32_0 = arith.constant 0 : i32
    %3 = arith.cmpi slt, %arg1, %c0_i32_0 : i32
    %4 = arith.extui %3 : i1 to i32
    %5 = arith.sitofp %4 : i32 to f32
    %c0 = arith.constant 0 : index
    %c0_1 = arith.constant 0 : index
    %c0_2 = arith.constant 0 : index
    %6 = vector.load %arg6[%c0, %c0_1, %c0_2] : memref<1x1x128xf32, #tpu.memory_space<vmem>>, vector<1x1x128xf32>
    %7 = vector.shape_cast %6 : vector<1x1x128xf32> to vector<1x128xf32>
    %c0_3 = arith.constant 0 : index
    %c0_4 = arith.constant 0 : index
    %c0_5 = arith.constant 0 : index
    %8 = vector.load %arg5[%c0_3, %c0_4, %c0_5] : memref<1x1x128xf32, #tpu.memory_space<vmem>>, vector<1x1x128xf32>
    %9 = vector.shape_cast %8 : vector<1x1x128xf32> to vector<1x128xf32>
    %10 = vector.broadcast %2 : f32 to vector<1x128xf32>
    %11 = arith.mulf %9, %10 : vector<1x128xf32>
    %c0_6 = arith.constant 0 : index
    %c0_7 = arith.constant 0 : index
    %c0_8 = arith.constant 0 : index
    %12 = vector.load %arg7[%c0_6, %c0_7, %c0_8] : memref<1x1x128xf32, #tpu.memory_space<vmem>>, vector<1x1x128xf32>
    %13 = vector.shape_cast %12 : vector<1x1x128xf32> to vector<1x128xf32>
    %14 = vector.broadcast %5 : f32 to vector<1x128xf32>
    %15 = arith.mulf %13, %14 : vector<1x128xf32>
    %16 = tpu.concatenate %11, %7, %15 in 1 : vector<1x128xf32>, vector<1x128xf32>, vector<1x128xf32> -> vector<1x384xf32>
    %c0_9 = arith.constant 0 : index
    %c0_10 = arith.constant 0 : index
    %c0_11 = arith.constant 0 : index
    %17 = vector.load %arg2[%c0_9, %c0_10, %c0_11] : memref<1x4x128xf32, #tpu.memory_space<vmem>>, vector<1x4x128xf32>
    %18 = vector.shape_cast %17 : vector<1x4x128xf32> to vector<4x128xf32>
    %c0_12 = arith.constant 0 : index
    %c0_13 = arith.constant 0 : index
    %c0_14 = arith.constant 0 : index
    %19 = vector.load %arg3[%c0_12, %c0_13, %c0_14] : memref<1x4x128xf32, #tpu.memory_space<vmem>>, vector<1x4x128xf32>
    %20 = vector.shape_cast %19 : vector<1x4x128xf32> to vector<4x128xf32>
    %c0_15 = arith.constant 0 : index
    %c0_16 = arith.constant 0 : index
    %c0_17 = arith.constant 0 : index
    %21 = vector.load %arg4[%c0_15, %c0_16, %c0_17] : memref<1x4x128xf32, #tpu.memory_space<vmem>>, vector<1x4x128xf32>
    %22 = vector.shape_cast %21 : vector<1x4x128xf32> to vector<4x128xf32>
    %23 = tpu.concatenate %18, %20, %22 in 1 : vector<4x128xf32>, vector<4x128xf32>, vector<4x128xf32> -> vector<4x384xf32>
    %24 = arith.truncf %23 : vector<4x384xf32> to vector<4x384xbf16>
    %c0_18 = arith.constant 0 : index
    %c0_19 = arith.constant 0 : index
    %25 = vector.load %arg10[%c0_18, %c0_19] : memref<16x4xbf16, #tpu.memory_space<vmem>>, vector<16x4xbf16>
    %cst = arith.constant dense<0.000000e+00> : vector<16x384xf32>
    %26 = tpu.matmul %25, %24, %cst {dimension_numbers = #tpu.dot_dimension_numbers<[1], [0], [0], [1], [0, 0, 1, 1], [], []>} : vector<16x4xbf16>, vector<4x384xbf16>, vector<16x384xf32> -> vector<16x384xf32>
    %c0_20 = arith.constant 0 : index
    %c0_21 = arith.constant 0 : index
    %27 = vector.load %arg11[%c0_20, %c0_21] : memref<16x1xf32, #tpu.memory_space<vmem>>, vector<16x1xf32>
    %28 = vector.broadcast %27 : vector<16x1xf32> to vector<16x384xf32>
    %29 = arith.addf %26, %28 : vector<16x384xf32>
    %30 = vector.broadcast %16 : vector<1x384xf32> to vector<16x384xf32>
    %31 = arith.mulf %29, %30 : vector<16x384xf32>
    %cst_22 = arith.constant 0.000000e+00 : f32
    %32 = vector.broadcast %cst_22 : f32 to vector<16x128xf32>
    %33 = arith.truncf %31 : vector<16x384xf32> to vector<16x384xbf16>
    %34 = vector.extract_strided_slice %33 {offsets = [0, 0], sizes = [16, 380], strides = [1, 1]} : vector<16x384xbf16> to vector<16x380xbf16>
    %c0_23 = arith.constant 0 : index
    %c0_24 = arith.constant 0 : index
    %c0_25 = arith.constant 0 : index
    %c0_26 = arith.constant 0 : index
    %35 = vector.load %arg12[%c0_23, %c0_24, %c0_25, %c0_26] : memref<4x5x32x16xbf16, #tpu.memory_space<vmem>>, vector<1x1x32x16xbf16>
    %36 = vector.shape_cast %35 : vector<1x1x32x16xbf16> to vector<32x16xbf16>
    %cst_27 = arith.constant dense<0.000000e+00> : vector<32x380xf32>
    %37 = tpu.matmul %36, %34, %cst_27 {dimension_numbers = #tpu.dot_dimension_numbers<[1], [0], [0], [1], [0, 0, 1, 1], [], []>} : vector<32x16xbf16>, vector<16x380xbf16>, vector<32x380xf32> -> vector<32x380xf32>
    %38 = vector.extract_strided_slice %33 {offsets = [0, 1], sizes = [16, 380], strides = [1, 1]} : vector<16x384xbf16> to vector<16x380xbf16>
    %c0_28 = arith.constant 0 : index
    %c1 = arith.constant 1 : index
    %c0_29 = arith.constant 0 : index
    %c0_30 = arith.constant 0 : index
    %39 = vector.load %arg12[%c0_28, %c1, %c0_29, %c0_30] : memref<4x5x32x16xbf16, #tpu.memory_space<vmem>>, vector<1x1x32x16xbf16>
    %40 = vector.shape_cast %39 : vector<1x1x32x16xbf16> to vector<32x16xbf16>
    %cst_31 = arith.constant dense<0.000000e+00> : vector<32x380xf32>
    %41 = tpu.matmul %40, %38, %cst_31 {dimension_numbers = #tpu.dot_dimension_numbers<[1], [0], [0], [1], [0, 0, 1, 1], [], []>} : vector<32x16xbf16>, vector<16x380xbf16>, vector<32x380xf32> -> vector<32x380xf32>
    %42 = arith.addf %37, %41 : vector<32x380xf32>
    %43 = vector.extract_strided_slice %33 {offsets = [0, 2], sizes = [16, 380], strides = [1, 1]} : vector<16x384xbf16> to vector<16x380xbf16>
    %c0_32 = arith.constant 0 : index
    %c2 = arith.constant 2 : index
    %c0_33 = arith.constant 0 : index
    %c0_34 = arith.constant 0 : index
    %44 = vector.load %arg12[%c0_32, %c2, %c0_33, %c0_34] : memref<4x5x32x16xbf16, #tpu.memory_space<vmem>>, vector<1x1x32x16xbf16>
    %45 = vector.shape_cast %44 : vector<1x1x32x16xbf16> to vector<32x16xbf16>
    %cst_35 = arith.constant dense<0.000000e+00> : vector<32x380xf32>
    %46 = tpu.matmul %45, %43, %cst_35 {dimension_numbers = #tpu.dot_dimension_numbers<[1], [0], [0], [1], [0, 0, 1, 1], [], []>} : vector<32x16xbf16>, vector<16x380xbf16>, vector<32x380xf32> -> vector<32x380xf32>
    %47 = arith.addf %42, %46 : vector<32x380xf32>
    %48 = vector.extract_strided_slice %33 {offsets = [0, 3], sizes = [16, 380], strides = [1, 1]} : vector<16x384xbf16> to vector<16x380xbf16>
    %c0_36 = arith.constant 0 : index
    %c3 = arith.constant 3 : index
    %c0_37 = arith.constant 0 : index
    %c0_38 = arith.constant 0 : index
    %49 = vector.load %arg12[%c0_36, %c3, %c0_37, %c0_38] : memref<4x5x32x16xbf16, #tpu.memory_space<vmem>>, vector<1x1x32x16xbf16>
    %50 = vector.shape_cast %49 : vector<1x1x32x16xbf16> to vector<32x16xbf16>
    %cst_39 = arith.constant dense<0.000000e+00> : vector<32x380xf32>
    %51 = tpu.matmul %50, %48, %cst_39 {dimension_numbers = #tpu.dot_dimension_numbers<[1], [0], [0], [1], [0, 0, 1, 1], [], []>} : vector<32x16xbf16>, vector<16x380xbf16>, vector<32x380xf32> -> vector<32x380xf32>
    %52 = arith.addf %47, %51 : vector<32x380xf32>
    %53 = vector.extract_strided_slice %33 {offsets = [0, 4], sizes = [16, 380], strides = [1, 1]} : vector<16x384xbf16> to vector<16x380xbf16>
    %c0_40 = arith.constant 0 : index
    %c4 = arith.constant 4 : index
    %c0_41 = arith.constant 0 : index
    %c0_42 = arith.constant 0 : index
    %54 = vector.load %arg12[%c0_40, %c4, %c0_41, %c0_42] : memref<4x5x32x16xbf16, #tpu.memory_space<vmem>>, vector<1x1x32x16xbf16>
    %55 = vector.shape_cast %54 : vector<1x1x32x16xbf16> to vector<32x16xbf16>
    %cst_43 = arith.constant dense<0.000000e+00> : vector<32x380xf32>
    %56 = tpu.matmul %55, %53, %cst_43 {dimension_numbers = #tpu.dot_dimension_numbers<[1], [0], [0], [1], [0, 0, 1, 1], [], []>} : vector<32x16xbf16>, vector<16x380xbf16>, vector<32x380xf32> -> vector<32x380xf32>
    %57 = arith.addf %52, %56 : vector<32x380xf32>
    %c0_44 = arith.constant 0 : index
    %c0_45 = arith.constant 0 : index
    %c0_46 = arith.constant 0 : index
    %c0_47 = arith.constant 0 : index
    %58 = vector.load %arg9[%c0_44, %c0_45, %c0_46, %c0_47] : memref<1x4x32x1xf32, #tpu.memory_space<vmem>>, vector<1x1x32x1xf32>
    %59 = vector.shape_cast %58 : vector<1x1x32x1xf32> to vector<32x1xf32>
    %60 = vector.broadcast %59 : vector<32x1xf32> to vector<32x380xf32>
    %61 = arith.addf %57, %60 : vector<32x380xf32>
    %62 = vector.extract_strided_slice %61 {offsets = [0, 0], sizes = [16, 380], strides = [1, 1]} : vector<32x380xf32> to vector<16x380xf32>
    %63 = math.tanh %62 : vector<16x380xf32>
    %64 = vector.extract_strided_slice %61 {offsets = [16, 0], sizes = [16, 380], strides = [1, 1]} : vector<32x380xf32> to vector<16x380xf32>
    %65 = arith.negf %64 : vector<16x380xf32>
    %66 = math.exp %65 : vector<16x380xf32>
    %cst_48 = arith.constant 1.000000e+00 : f32
    %67 = vector.broadcast %cst_48 : f32 to vector<16x380xf32>
    %68 = arith.addf %67, %66 : vector<16x380xf32>
    %69 = arith.divf %67, %68 : vector<16x380xf32>
    %70 = arith.mulf %63, %69 : vector<16x380xf32>
    %c0_49 = arith.constant 0 : index
    %c0_50 = arith.constant 0 : index
    %c0_51 = arith.constant 0 : index
    %71 = vector.load %arg13[%c0_49, %c0_50, %c0_51] : memref<4x32x16xbf16, #tpu.memory_space<vmem>>, vector<1x32x16xbf16>
    %72 = vector.shape_cast %71 : vector<1x32x16xbf16> to vector<32x16xbf16>
    %73 = arith.truncf %70 : vector<16x380xf32> to vector<16x380xbf16>
    %cst_52 = arith.constant dense<0.000000e+00> : vector<32x380xf32>
    %74 = tpu.matmul %72, %73, %cst_52 {dimension_numbers = #tpu.dot_dimension_numbers<[1], [0], [0], [1], [0, 0, 1, 1], [], []>} : vector<32x16xbf16>, vector<16x380xbf16>, vector<32x380xf32> -> vector<32x380xf32>
    %c0_53 = arith.constant 0 : index
    %c0_54 = arith.constant 0 : index
    %c0_55 = arith.constant 0 : index
    %75 = vector.load %arg14[%c0_53, %c0_54, %c0_55] : memref<4x32x1xf32, #tpu.memory_space<vmem>>, vector<1x32x1xf32>
    %76 = vector.shape_cast %75 : vector<1x32x1xf32> to vector<32x1xf32>
    %77 = vector.broadcast %76 : vector<32x1xf32> to vector<32x380xf32>
    %78 = arith.addf %74, %77 : vector<32x380xf32>
    %79 = vector.extract_strided_slice %78 {offsets = [16, 126], sizes = [16, 128], strides = [1, 1]} : vector<32x380xf32> to vector<16x128xf32>
    %80 = arith.addf %32, %79 : vector<16x128xf32>
    %81 = vector.extract_strided_slice %31 {offsets = [0, 2], sizes = [16, 380], strides = [1, 1]} : vector<16x384xf32> to vector<16x380xf32>
    %82 = vector.extract_strided_slice %78 {offsets = [0, 0], sizes = [16, 380], strides = [1, 1]} : vector<32x380xf32> to vector<16x380xf32>
    %83 = arith.addf %81, %82 : vector<16x380xf32>
    %84 = vector.extract_strided_slice %16 {offsets = [0, 2], sizes = [1, 380], strides = [1, 1]} : vector<1x384xf32> to vector<1x380xf32>
    %85 = vector.broadcast %84 : vector<1x380xf32> to vector<16x380xf32>
    %86 = arith.mulf %83, %85 : vector<16x380xf32>
    %87 = arith.truncf %86 : vector<16x380xf32> to vector<16x380xbf16>
    %88 = vector.extract_strided_slice %87 {offsets = [0, 0], sizes = [16, 376], strides = [1, 1]} : vector<16x380xbf16> to vector<16x376xbf16>
    %c1_56 = arith.constant 1 : index
    %c0_57 = arith.constant 0 : index
    %c0_58 = arith.constant 0 : index
    %c0_59 = arith.constant 0 : index
    %89 = vector.load %arg12[%c1_56, %c0_57, %c0_58, %c0_59] : memref<4x5x32x16xbf16, #tpu.memory_space<vmem>>, vector<1x1x32x16xbf16>
    %90 = vector.shape_cast %89 : vector<1x1x32x16xbf16> to vector<32x16xbf16>
    %cst_60 = arith.constant dense<0.000000e+00> : vector<32x376xf32>
    %91 = tpu.matmul %90, %88, %cst_60 {dimension_numbers = #tpu.dot_dimension_numbers<[1], [0], [0], [1], [0, 0, 1, 1], [], []>} : vector<32x16xbf16>, vector<16x376xbf16>, vector<32x376xf32> -> vector<32x376xf32>
    %92 = vector.extract_strided_slice %87 {offsets = [0, 1], sizes = [16, 376], strides = [1, 1]} : vector<16x380xbf16> to vector<16x376xbf16>
    %c1_61 = arith.constant 1 : index
    %c1_62 = arith.constant 1 : index
    %c0_63 = arith.constant 0 : index
    %c0_64 = arith.constant 0 : index
    %93 = vector.load %arg12[%c1_61, %c1_62, %c0_63, %c0_64] : memref<4x5x32x16xbf16, #tpu.memory_space<vmem>>, vector<1x1x32x16xbf16>
    %94 = vector.shape_cast %93 : vector<1x1x32x16xbf16> to vector<32x16xbf16>
    %cst_65 = arith.constant dense<0.000000e+00> : vector<32x376xf32>
    %95 = tpu.matmul %94, %92, %cst_65 {dimension_numbers = #tpu.dot_dimension_numbers<[1], [0], [0], [1], [0, 0, 1, 1], [], []>} : vector<32x16xbf16>, vector<16x376xbf16>, vector<32x376xf32> -> vector<32x376xf32>
    %96 = arith.addf %91, %95 : vector<32x376xf32>
    %97 = vector.extract_strided_slice %87 {offsets = [0, 2], sizes = [16, 376], strides = [1, 1]} : vector<16x380xbf16> to vector<16x376xbf16>
    %c1_66 = arith.constant 1 : index
    %c2_67 = arith.constant 2 : index
    %c0_68 = arith.constant 0 : index
    %c0_69 = arith.constant 0 : index
    %98 = vector.load %arg12[%c1_66, %c2_67, %c0_68, %c0_69] : memref<4x5x32x16xbf16, #tpu.memory_space<vmem>>, vector<1x1x32x16xbf16>
    %99 = vector.shape_cast %98 : vector<1x1x32x16xbf16> to vector<32x16xbf16>
    %cst_70 = arith.constant dense<0.000000e+00> : vector<32x376xf32>
    %100 = tpu.matmul %99, %97, %cst_70 {dimension_numbers = #tpu.dot_dimension_numbers<[1], [0], [0], [1], [0, 0, 1, 1], [], []>} : vector<32x16xbf16>, vector<16x376xbf16>, vector<32x376xf32> -> vector<32x376xf32>
    %101 = arith.addf %96, %100 : vector<32x376xf32>
    %102 = vector.extract_strided_slice %87 {offsets = [0, 3], sizes = [16, 376], strides = [1, 1]} : vector<16x380xbf16> to vector<16x376xbf16>
    %c1_71 = arith.constant 1 : index
    %c3_72 = arith.constant 3 : index
    %c0_73 = arith.constant 0 : index
    %c0_74 = arith.constant 0 : index
    %103 = vector.load %arg12[%c1_71, %c3_72, %c0_73, %c0_74] : memref<4x5x32x16xbf16, #tpu.memory_space<vmem>>, vector<1x1x32x16xbf16>
    %104 = vector.shape_cast %103 : vector<1x1x32x16xbf16> to vector<32x16xbf16>
    %cst_75 = arith.constant dense<0.000000e+00> : vector<32x376xf32>
    %105 = tpu.matmul %104, %102, %cst_75 {dimension_numbers = #tpu.dot_dimension_numbers<[1], [0], [0], [1], [0, 0, 1, 1], [], []>} : vector<32x16xbf16>, vector<16x376xbf16>, vector<32x376xf32> -> vector<32x376xf32>
    %106 = arith.addf %101, %105 : vector<32x376xf32>
    %107 = vector.extract_strided_slice %87 {offsets = [0, 4], sizes = [16, 376], strides = [1, 1]} : vector<16x380xbf16> to vector<16x376xbf16>
    %c1_76 = arith.constant 1 : index
    %c4_77 = arith.constant 4 : index
    %c0_78 = arith.constant 0 : index
    %c0_79 = arith.constant 0 : index
    %108 = vector.load %arg12[%c1_76, %c4_77, %c0_78, %c0_79] : memref<4x5x32x16xbf16, #tpu.memory_space<vmem>>, vector<1x1x32x16xbf16>
    %109 = vector.shape_cast %108 : vector<1x1x32x16xbf16> to vector<32x16xbf16>
    %cst_80 = arith.constant dense<0.000000e+00> : vector<32x376xf32>
    %110 = tpu.matmul %109, %107, %cst_80 {dimension_numbers = #tpu.dot_dimension_numbers<[1], [0], [0], [1], [0, 0, 1, 1], [], []>} : vector<32x16xbf16>, vector<16x376xbf16>, vector<32x376xf32> -> vector<32x376xf32>
    %111 = arith.addf %106, %110 : vector<32x376xf32>
    %c0_81 = arith.constant 0 : index
    %c1_82 = arith.constant 1 : index
    %c0_83 = arith.constant 0 : index
    %c0_84 = arith.constant 0 : index
    %112 = vector.load %arg9[%c0_81, %c1_82, %c0_83, %c0_84] : memref<1x4x32x1xf32, #tpu.memory_space<vmem>>, vector<1x1x32x1xf32>
    %113 = vector.shape_cast %112 : vector<1x1x32x1xf32> to vector<32x1xf32>
    %114 = vector.broadcast %113 : vector<32x1xf32> to vector<32x376xf32>
    %115 = arith.addf %111, %114 : vector<32x376xf32>
    %116 = vector.extract_strided_slice %115 {offsets = [0, 0], sizes = [16, 376], strides = [1, 1]} : vector<32x376xf32> to vector<16x376xf32>
    %117 = math.tanh %116 : vector<16x376xf32>
    %118 = vector.extract_strided_slice %115 {offsets = [16, 0], sizes = [16, 376], strides = [1, 1]} : vector<32x376xf32> to vector<16x376xf32>
    %119 = arith.negf %118 : vector<16x376xf32>
    %120 = math.exp %119 : vector<16x376xf32>
    %cst_85 = arith.constant 1.000000e+00 : f32
    %121 = vector.broadcast %cst_85 : f32 to vector<16x376xf32>
    %122 = arith.addf %121, %120 : vector<16x376xf32>
    %123 = arith.divf %121, %122 : vector<16x376xf32>
    %124 = arith.mulf %117, %123 : vector<16x376xf32>
    %c1_86 = arith.constant 1 : index
    %c0_87 = arith.constant 0 : index
    %c0_88 = arith.constant 0 : index
    %125 = vector.load %arg13[%c1_86, %c0_87, %c0_88] : memref<4x32x16xbf16, #tpu.memory_space<vmem>>, vector<1x32x16xbf16>
    %126 = vector.shape_cast %125 : vector<1x32x16xbf16> to vector<32x16xbf16>
    %127 = arith.truncf %124 : vector<16x376xf32> to vector<16x376xbf16>
    %cst_89 = arith.constant dense<0.000000e+00> : vector<32x376xf32>
    %128 = tpu.matmul %126, %127, %cst_89 {dimension_numbers = #tpu.dot_dimension_numbers<[1], [0], [0], [1], [0, 0, 1, 1], [], []>} : vector<32x16xbf16>, vector<16x376xbf16>, vector<32x376xf32> -> vector<32x376xf32>
    %c1_90 = arith.constant 1 : index
    %c0_91 = arith.constant 0 : index
    %c0_92 = arith.constant 0 : index
    %129 = vector.load %arg14[%c1_90, %c0_91, %c0_92] : memref<4x32x1xf32, #tpu.memory_space<vmem>>, vector<1x32x1xf32>
    %130 = vector.shape_cast %129 : vector<1x32x1xf32> to vector<32x1xf32>
    %131 = vector.broadcast %130 : vector<32x1xf32> to vector<32x376xf32>
    %132 = arith.addf %128, %131 : vector<32x376xf32>
    %133 = vector.extract_strided_slice %132 {offsets = [16, 124], sizes = [16, 128], strides = [1, 1]} : vector<32x376xf32> to vector<16x128xf32>
    %134 = arith.addf %80, %133 : vector<16x128xf32>
    %135 = vector.extract_strided_slice %86 {offsets = [0, 2], sizes = [16, 376], strides = [1, 1]} : vector<16x380xf32> to vector<16x376xf32>
    %136 = vector.extract_strided_slice %132 {offsets = [0, 0], sizes = [16, 376], strides = [1, 1]} : vector<32x376xf32> to vector<16x376xf32>
    %137 = arith.addf %135, %136 : vector<16x376xf32>
    %138 = vector.extract_strided_slice %16 {offsets = [0, 4], sizes = [1, 376], strides = [1, 1]} : vector<1x384xf32> to vector<1x376xf32>
    %139 = vector.broadcast %138 : vector<1x376xf32> to vector<16x376xf32>
    %140 = arith.mulf %137, %139 : vector<16x376xf32>
    %141 = arith.truncf %140 : vector<16x376xf32> to vector<16x376xbf16>
    %142 = vector.extract_strided_slice %141 {offsets = [0, 0], sizes = [16, 372], strides = [1, 1]} : vector<16x376xbf16> to vector<16x372xbf16>
    %c2_93 = arith.constant 2 : index
    %c0_94 = arith.constant 0 : index
    %c0_95 = arith.constant 0 : index
    %c0_96 = arith.constant 0 : index
    %143 = vector.load %arg12[%c2_93, %c0_94, %c0_95, %c0_96] : memref<4x5x32x16xbf16, #tpu.memory_space<vmem>>, vector<1x1x32x16xbf16>
    %144 = vector.shape_cast %143 : vector<1x1x32x16xbf16> to vector<32x16xbf16>
    %cst_97 = arith.constant dense<0.000000e+00> : vector<32x372xf32>
    %145 = tpu.matmul %144, %142, %cst_97 {dimension_numbers = #tpu.dot_dimension_numbers<[1], [0], [0], [1], [0, 0, 1, 1], [], []>} : vector<32x16xbf16>, vector<16x372xbf16>, vector<32x372xf32> -> vector<32x372xf32>
    %146 = vector.extract_strided_slice %141 {offsets = [0, 1], sizes = [16, 372], strides = [1, 1]} : vector<16x376xbf16> to vector<16x372xbf16>
    %c2_98 = arith.constant 2 : index
    %c1_99 = arith.constant 1 : index
    %c0_100 = arith.constant 0 : index
    %c0_101 = arith.constant 0 : index
    %147 = vector.load %arg12[%c2_98, %c1_99, %c0_100, %c0_101] : memref<4x5x32x16xbf16, #tpu.memory_space<vmem>>, vector<1x1x32x16xbf16>
    %148 = vector.shape_cast %147 : vector<1x1x32x16xbf16> to vector<32x16xbf16>
    %cst_102 = arith.constant dense<0.000000e+00> : vector<32x372xf32>
    %149 = tpu.matmul %148, %146, %cst_102 {dimension_numbers = #tpu.dot_dimension_numbers<[1], [0], [0], [1], [0, 0, 1, 1], [], []>} : vector<32x16xbf16>, vector<16x372xbf16>, vector<32x372xf32> -> vector<32x372xf32>
    %150 = arith.addf %145, %149 : vector<32x372xf32>
    %151 = vector.extract_strided_slice %141 {offsets = [0, 2], sizes = [16, 372], strides = [1, 1]} : vector<16x376xbf16> to vector<16x372xbf16>
    %c2_103 = arith.constant 2 : index
    %c2_104 = arith.constant 2 : index
    %c0_105 = arith.constant 0 : index
    %c0_106 = arith.constant 0 : index
    %152 = vector.load %arg12[%c2_103, %c2_104, %c0_105, %c0_106] : memref<4x5x32x16xbf16, #tpu.memory_space<vmem>>, vector<1x1x32x16xbf16>
    %153 = vector.shape_cast %152 : vector<1x1x32x16xbf16> to vector<32x16xbf16>
    %cst_107 = arith.constant dense<0.000000e+00> : vector<32x372xf32>
    %154 = tpu.matmul %153, %151, %cst_107 {dimension_numbers = #tpu.dot_dimension_numbers<[1], [0], [0], [1], [0, 0, 1, 1], [], []>} : vector<32x16xbf16>, vector<16x372xbf16>, vector<32x372xf32> -> vector<32x372xf32>
    %155 = arith.addf %150, %154 : vector<32x372xf32>
    %156 = vector.extract_strided_slice %141 {offsets = [0, 3], sizes = [16, 372], strides = [1, 1]} : vector<16x376xbf16> to vector<16x372xbf16>
    %c2_108 = arith.constant 2 : index
    %c3_109 = arith.constant 3 : index
    %c0_110 = arith.constant 0 : index
    %c0_111 = arith.constant 0 : index
    %157 = vector.load %arg12[%c2_108, %c3_109, %c0_110, %c0_111] : memref<4x5x32x16xbf16, #tpu.memory_space<vmem>>, vector<1x1x32x16xbf16>
    %158 = vector.shape_cast %157 : vector<1x1x32x16xbf16> to vector<32x16xbf16>
    %cst_112 = arith.constant dense<0.000000e+00> : vector<32x372xf32>
    %159 = tpu.matmul %158, %156, %cst_112 {dimension_numbers = #tpu.dot_dimension_numbers<[1], [0], [0], [1], [0, 0, 1, 1], [], []>} : vector<32x16xbf16>, vector<16x372xbf16>, vector<32x372xf32> -> vector<32x372xf32>
    %160 = arith.addf %155, %159 : vector<32x372xf32>
    %161 = vector.extract_strided_slice %141 {offsets = [0, 4], sizes = [16, 372], strides = [1, 1]} : vector<16x376xbf16> to vector<16x372xbf16>
    %c2_113 = arith.constant 2 : index
    %c4_114 = arith.constant 4 : index
    %c0_115 = arith.constant 0 : index
    %c0_116 = arith.constant 0 : index
    %162 = vector.load %arg12[%c2_113, %c4_114, %c0_115, %c0_116] : memref<4x5x32x16xbf16, #tpu.memory_space<vmem>>, vector<1x1x32x16xbf16>
    %163 = vector.shape_cast %162 : vector<1x1x32x16xbf16> to vector<32x16xbf16>
    %cst_117 = arith.constant dense<0.000000e+00> : vector<32x372xf32>
    %164 = tpu.matmul %163, %161, %cst_117 {dimension_numbers = #tpu.dot_dimension_numbers<[1], [0], [0], [1], [0, 0, 1, 1], [], []>} : vector<32x16xbf16>, vector<16x372xbf16>, vector<32x372xf32> -> vector<32x372xf32>
    %165 = arith.addf %160, %164 : vector<32x372xf32>
    %c0_118 = arith.constant 0 : index
    %c2_119 = arith.constant 2 : index
    %c0_120 = arith.constant 0 : index
    %c0_121 = arith.constant 0 : index
    %166 = vector.load %arg9[%c0_118, %c2_119, %c0_120, %c0_121] : memref<1x4x32x1xf32, #tpu.memory_space<vmem>>, vector<1x1x32x1xf32>
    %167 = vector.shape_cast %166 : vector<1x1x32x1xf32> to vector<32x1xf32>
    %168 = vector.broadcast %167 : vector<32x1xf32> to vector<32x372xf32>
    %169 = arith.addf %165, %168 : vector<32x372xf32>
    %170 = vector.extract_strided_slice %169 {offsets = [0, 0], sizes = [16, 372], strides = [1, 1]} : vector<32x372xf32> to vector<16x372xf32>
    %171 = math.tanh %170 : vector<16x372xf32>
    %172 = vector.extract_strided_slice %169 {offsets = [16, 0], sizes = [16, 372], strides = [1, 1]} : vector<32x372xf32> to vector<16x372xf32>
    %173 = arith.negf %172 : vector<16x372xf32>
    %174 = math.exp %173 : vector<16x372xf32>
    %cst_122 = arith.constant 1.000000e+00 : f32
    %175 = vector.broadcast %cst_122 : f32 to vector<16x372xf32>
    %176 = arith.addf %175, %174 : vector<16x372xf32>
    %177 = arith.divf %175, %176 : vector<16x372xf32>
    %178 = arith.mulf %171, %177 : vector<16x372xf32>
    %c2_123 = arith.constant 2 : index
    %c0_124 = arith.constant 0 : index
    %c0_125 = arith.constant 0 : index
    %179 = vector.load %arg13[%c2_123, %c0_124, %c0_125] : memref<4x32x16xbf16, #tpu.memory_space<vmem>>, vector<1x32x16xbf16>
    %180 = vector.shape_cast %179 : vector<1x32x16xbf16> to vector<32x16xbf16>
    %181 = arith.truncf %178 : vector<16x372xf32> to vector<16x372xbf16>
    %cst_126 = arith.constant dense<0.000000e+00> : vector<32x372xf32>
    %182 = tpu.matmul %180, %181, %cst_126 {dimension_numbers = #tpu.dot_dimension_numbers<[1], [0], [0], [1], [0, 0, 1, 1], [], []>} : vector<32x16xbf16>, vector<16x372xbf16>, vector<32x372xf32> -> vector<32x372xf32>
    %c2_127 = arith.constant 2 : index
    %c0_128 = arith.constant 0 : index
    %c0_129 = arith.constant 0 : index
    %183 = vector.load %arg14[%c2_127, %c0_128, %c0_129] : memref<4x32x1xf32, #tpu.memory_space<vmem>>, vector<1x32x1xf32>
    %184 = vector.shape_cast %183 : vector<1x32x1xf32> to vector<32x1xf32>
    %185 = vector.broadcast %184 : vector<32x1xf32> to vector<32x372xf32>
    %186 = arith.addf %182, %185 : vector<32x372xf32>
    %187 = vector.extract_strided_slice %186 {offsets = [16, 122], sizes = [16, 128], strides = [1, 1]} : vector<32x372xf32> to vector<16x128xf32>
    %188 = arith.addf %134, %187 : vector<16x128xf32>
    %189 = vector.extract_strided_slice %140 {offsets = [0, 2], sizes = [16, 372], strides = [1, 1]} : vector<16x376xf32> to vector<16x372xf32>
    %190 = vector.extract_strided_slice %186 {offsets = [0, 0], sizes = [16, 372], strides = [1, 1]} : vector<32x372xf32> to vector<16x372xf32>
    %191 = arith.addf %189, %190 : vector<16x372xf32>
    %192 = vector.extract_strided_slice %16 {offsets = [0, 6], sizes = [1, 372], strides = [1, 1]} : vector<1x384xf32> to vector<1x372xf32>
    %193 = vector.broadcast %192 : vector<1x372xf32> to vector<16x372xf32>
    %194 = arith.mulf %191, %193 : vector<16x372xf32>
    %195 = arith.truncf %194 : vector<16x372xf32> to vector<16x372xbf16>
    %196 = vector.extract_strided_slice %195 {offsets = [0, 0], sizes = [16, 368], strides = [1, 1]} : vector<16x372xbf16> to vector<16x368xbf16>
    %c3_130 = arith.constant 3 : index
    %c0_131 = arith.constant 0 : index
    %c0_132 = arith.constant 0 : index
    %c0_133 = arith.constant 0 : index
    %197 = vector.load %arg12[%c3_130, %c0_131, %c0_132, %c0_133] : memref<4x5x32x16xbf16, #tpu.memory_space<vmem>>, vector<1x1x32x16xbf16>
    %198 = vector.shape_cast %197 : vector<1x1x32x16xbf16> to vector<32x16xbf16>
    %cst_134 = arith.constant dense<0.000000e+00> : vector<32x368xf32>
    %199 = tpu.matmul %198, %196, %cst_134 {dimension_numbers = #tpu.dot_dimension_numbers<[1], [0], [0], [1], [0, 0, 1, 1], [], []>} : vector<32x16xbf16>, vector<16x368xbf16>, vector<32x368xf32> -> vector<32x368xf32>
    %200 = vector.extract_strided_slice %195 {offsets = [0, 1], sizes = [16, 368], strides = [1, 1]} : vector<16x372xbf16> to vector<16x368xbf16>
    %c3_135 = arith.constant 3 : index
    %c1_136 = arith.constant 1 : index
    %c0_137 = arith.constant 0 : index
    %c0_138 = arith.constant 0 : index
    %201 = vector.load %arg12[%c3_135, %c1_136, %c0_137, %c0_138] : memref<4x5x32x16xbf16, #tpu.memory_space<vmem>>, vector<1x1x32x16xbf16>
    %202 = vector.shape_cast %201 : vector<1x1x32x16xbf16> to vector<32x16xbf16>
    %cst_139 = arith.constant dense<0.000000e+00> : vector<32x368xf32>
    %203 = tpu.matmul %202, %200, %cst_139 {dimension_numbers = #tpu.dot_dimension_numbers<[1], [0], [0], [1], [0, 0, 1, 1], [], []>} : vector<32x16xbf16>, vector<16x368xbf16>, vector<32x368xf32> -> vector<32x368xf32>
    %204 = arith.addf %199, %203 : vector<32x368xf32>
    %205 = vector.extract_strided_slice %195 {offsets = [0, 2], sizes = [16, 368], strides = [1, 1]} : vector<16x372xbf16> to vector<16x368xbf16>
    %c3_140 = arith.constant 3 : index
    %c2_141 = arith.constant 2 : index
    %c0_142 = arith.constant 0 : index
    %c0_143 = arith.constant 0 : index
    %206 = vector.load %arg12[%c3_140, %c2_141, %c0_142, %c0_143] : memref<4x5x32x16xbf16, #tpu.memory_space<vmem>>, vector<1x1x32x16xbf16>
    %207 = vector.shape_cast %206 : vector<1x1x32x16xbf16> to vector<32x16xbf16>
    %cst_144 = arith.constant dense<0.000000e+00> : vector<32x368xf32>
    %208 = tpu.matmul %207, %205, %cst_144 {dimension_numbers = #tpu.dot_dimension_numbers<[1], [0], [0], [1], [0, 0, 1, 1], [], []>} : vector<32x16xbf16>, vector<16x368xbf16>, vector<32x368xf32> -> vector<32x368xf32>
    %209 = arith.addf %204, %208 : vector<32x368xf32>
    %210 = vector.extract_strided_slice %195 {offsets = [0, 3], sizes = [16, 368], strides = [1, 1]} : vector<16x372xbf16> to vector<16x368xbf16>
    %c3_145 = arith.constant 3 : index
    %c3_146 = arith.constant 3 : index
    %c0_147 = arith.constant 0 : index
    %c0_148 = arith.constant 0 : index
    %211 = vector.load %arg12[%c3_145, %c3_146, %c0_147, %c0_148] : memref<4x5x32x16xbf16, #tpu.memory_space<vmem>>, vector<1x1x32x16xbf16>
    %212 = vector.shape_cast %211 : vector<1x1x32x16xbf16> to vector<32x16xbf16>
    %cst_149 = arith.constant dense<0.000000e+00> : vector<32x368xf32>
    %213 = tpu.matmul %212, %210, %cst_149 {dimension_numbers = #tpu.dot_dimension_numbers<[1], [0], [0], [1], [0, 0, 1, 1], [], []>} : vector<32x16xbf16>, vector<16x368xbf16>, vector<32x368xf32> -> vector<32x368xf32>
    %214 = arith.addf %209, %213 : vector<32x368xf32>
    %215 = vector.extract_strided_slice %195 {offsets = [0, 4], sizes = [16, 368], strides = [1, 1]} : vector<16x372xbf16> to vector<16x368xbf16>
    %c3_150 = arith.constant 3 : index
    %c4_151 = arith.constant 4 : index
    %c0_152 = arith.constant 0 : index
    %c0_153 = arith.constant 0 : index
    %216 = vector.load %arg12[%c3_150, %c4_151, %c0_152, %c0_153] : memref<4x5x32x16xbf16, #tpu.memory_space<vmem>>, vector<1x1x32x16xbf16>
    %217 = vector.shape_cast %216 : vector<1x1x32x16xbf16> to vector<32x16xbf16>
    %cst_154 = arith.constant dense<0.000000e+00> : vector<32x368xf32>
    %218 = tpu.matmul %217, %215, %cst_154 {dimension_numbers = #tpu.dot_dimension_numbers<[1], [0], [0], [1], [0, 0, 1, 1], [], []>} : vector<32x16xbf16>, vector<16x368xbf16>, vector<32x368xf32> -> vector<32x368xf32>
    %219 = arith.addf %214, %218 : vector<32x368xf32>
    %c0_155 = arith.constant 0 : index
    %c3_156 = arith.constant 3 : index
    %c0_157 = arith.constant 0 : index
    %c0_158 = arith.constant 0 : index
    %220 = vector.load %arg9[%c0_155, %c3_156, %c0_157, %c0_158] : memref<1x4x32x1xf32, #tpu.memory_space<vmem>>, vector<1x1x32x1xf32>
    %221 = vector.shape_cast %220 : vector<1x1x32x1xf32> to vector<32x1xf32>
    %222 = vector.broadcast %221 : vector<32x1xf32> to vector<32x368xf32>
    %223 = arith.addf %219, %222 : vector<32x368xf32>
    %224 = vector.extract_strided_slice %223 {offsets = [0, 0], sizes = [16, 368], strides = [1, 1]} : vector<32x368xf32> to vector<16x368xf32>
    %225 = math.tanh %224 : vector<16x368xf32>
    %226 = vector.extract_strided_slice %223 {offsets = [16, 0], sizes = [16, 368], strides = [1, 1]} : vector<32x368xf32> to vector<16x368xf32>
    %227 = arith.negf %226 : vector<16x368xf32>
    %228 = math.exp %227 : vector<16x368xf32>
    %cst_159 = arith.constant 1.000000e+00 : f32
    %229 = vector.broadcast %cst_159 : f32 to vector<16x368xf32>
    %230 = arith.addf %229, %228 : vector<16x368xf32>
    %231 = arith.divf %229, %230 : vector<16x368xf32>
    %232 = arith.mulf %225, %231 : vector<16x368xf32>
    %c3_160 = arith.constant 3 : index
    %c0_161 = arith.constant 0 : index
    %c0_162 = arith.constant 0 : index
    %233 = vector.load %arg13[%c3_160, %c0_161, %c0_162] : memref<4x32x16xbf16, #tpu.memory_space<vmem>>, vector<1x32x16xbf16>
    %234 = vector.shape_cast %233 : vector<1x32x16xbf16> to vector<32x16xbf16>
    %235 = arith.truncf %232 : vector<16x368xf32> to vector<16x368xbf16>
    %cst_163 = arith.constant dense<0.000000e+00> : vector<32x368xf32>
    %236 = tpu.matmul %234, %235, %cst_163 {dimension_numbers = #tpu.dot_dimension_numbers<[1], [0], [0], [1], [0, 0, 1, 1], [], []>} : vector<32x16xbf16>, vector<16x368xbf16>, vector<32x368xf32> -> vector<32x368xf32>
    %c3_164 = arith.constant 3 : index
    %c0_165 = arith.constant 0 : index
    %c0_166 = arith.constant 0 : index
    %237 = vector.load %arg14[%c3_164, %c0_165, %c0_166] : memref<4x32x1xf32, #tpu.memory_space<vmem>>, vector<1x32x1xf32>
    %238 = vector.shape_cast %237 : vector<1x32x1xf32> to vector<32x1xf32>
    %239 = vector.broadcast %238 : vector<32x1xf32> to vector<32x368xf32>
    %240 = arith.addf %236, %239 : vector<32x368xf32>
    %241 = vector.extract_strided_slice %240 {offsets = [16, 120], sizes = [16, 128], strides = [1, 1]} : vector<32x368xf32> to vector<16x128xf32>
    %242 = arith.addf %188, %241 : vector<16x128xf32>
    %243 = vector.broadcast %7 : vector<1x128xf32> to vector<16x128xf32>
    %244 = arith.mulf %242, %243 : vector<16x128xf32>
    %c0_167 = arith.constant 0 : index
    %c0_168 = arith.constant 0 : index
    %245 = vector.load %arg15[%c0_167, %c0_168] : memref<4x16xbf16, #tpu.memory_space<vmem>>, vector<4x16xbf16>
    %246 = arith.truncf %244 : vector<16x128xf32> to vector<16x128xbf16>
    %cst_169 = arith.constant dense<0.000000e+00> : vector<4x128xf32>
    %247 = tpu.matmul %245, %246, %cst_169 {dimension_numbers = #tpu.dot_dimension_numbers<[1], [0], [0], [1], [0, 0, 1, 1], [], []>} : vector<4x16xbf16>, vector<16x128xbf16>, vector<4x128xf32> -> vector<4x128xf32>
    %c0_170 = arith.constant 0 : index
    %c0_171 = arith.constant 0 : index
    %248 = vector.load %arg16[%c0_170, %c0_171] : memref<4x1xf32, #tpu.memory_space<vmem>>, vector<4x1xf32>
    %249 = vector.broadcast %248 : vector<4x1xf32> to vector<4x128xf32>
    %250 = arith.addf %247, %249 : vector<4x128xf32>
    %c0_172 = arith.constant 0 : index
    %c0_173 = arith.constant 0 : index
    %c0_174 = arith.constant 0 : index
    %251 = vector.load %arg8[%c0_172, %c0_173, %c0_174] : memref<1x4x128xf32, #tpu.memory_space<vmem>>, vector<1x4x128xf32>
    %252 = vector.shape_cast %251 : vector<1x4x128xf32> to vector<4x128xf32>
    %253 = arith.addf %250, %252 : vector<4x128xf32>
    %254 = vector.broadcast %7 : vector<1x128xf32> to vector<4x128xf32>
    %255 = arith.mulf %253, %254 : vector<4x128xf32>
    %c0_175 = arith.constant 0 : index
    %c0_176 = arith.constant 0 : index
    %c0_177 = arith.constant 0 : index
    %256 = vector.load %arg17[%c0_175, %c0_176, %c0_177] : memref<1x4x128xf32, #tpu.memory_space<vmem>>, vector<1x4x128xf32>
    %257 = vector.shape_cast %256 : vector<1x4x128xf32> to vector<4x128xf32>
    %258 = vector.shape_cast %255 : vector<4x128xf32> to vector<1x4x128xf32>
    tpu.vector_store %arg17[%c0_175, %c0_176, %c0_177], %258 {strides = array<i32>} : memref<1x4x128xf32, #tpu.memory_space<vmem>>, vector<1x4x128xf32>,
    return
  }
  func.func @transform_0(%arg0: i32, %arg1: i32) -> (i32, i32, i32) {
    %c1_i32 = arith.constant 1 : i32
    %0 = arith.muli %arg1, %c1_i32 : i32
    %c1_i32_0 = arith.constant 1 : i32
    %1 = arith.subi %0, %c1_i32_0 : i32
    %c0_i32 = arith.constant 0 : i32
    %2 = arith.maxsi %1, %c0_i32 : i32
    %c0_i32_1 = arith.constant 0 : i32
    %c0_i32_2 = arith.constant 0 : i32
    return %arg0, %c0_i32_1, %2 : i32, i32, i32
  }
  func.func @transform_1(%arg0: i32, %arg1: i32) -> (i32, i32, i32) {
    %c0_i32 = arith.constant 0 : i32
    %c0_i32_0 = arith.constant 0 : i32
    return %arg0, %c0_i32, %arg1 : i32, i32, i32
  }
  func.func @transform_2(%arg0: i32, %arg1: i32) -> (i32, i32, i32) {
    %c1_i32 = arith.constant 1 : i32
    %0 = arith.muli %arg1, %c1_i32 : i32
    %c1_i32_0 = arith.constant 1 : i32
    %1 = arith.addi %0, %c1_i32_0 : i32
    %c0_i32 = arith.constant 0 : i32
    %2 = arith.minsi %1, %c0_i32 : i32
    %c0_i32_1 = arith.constant 0 : i32
    %c0_i32_2 = arith.constant 0 : i32
    return %arg0, %c0_i32_1, %2 : i32, i32, i32
  }
  func.func @transform_3(%arg0: i32, %arg1: i32) -> (i32, i32, i32) {
    %c1_i32 = arith.constant 1 : i32
    %0 = arith.muli %arg1, %c1_i32 : i32
    %c1_i32_0 = arith.constant 1 : i32
    %1 = arith.subi %0, %c1_i32_0 : i32
    %c0_i32 = arith.constant 0 : i32
    %2 = arith.maxsi %1, %c0_i32 : i32
    %c0_i32_1 = arith.constant 0 : i32
    %c0_i32_2 = arith.constant 0 : i32
    return %arg0, %c0_i32_1, %2 : i32, i32, i32
  }
  func.func @transform_4(%arg0: i32, %arg1: i32) -> (i32, i32, i32) {
    %c0_i32 = arith.constant 0 : i32
    %c0_i32_0 = arith.constant 0 : i32
    return %arg0, %c0_i32, %arg1 : i32, i32, i32
  }
  func.func @transform_5(%arg0: i32, %arg1: i32) -> (i32, i32, i32) {
    %c1_i32 = arith.constant 1 : i32
    %0 = arith.muli %arg1, %c1_i32 : i32
    %c1_i32_0 = arith.constant 1 : i32
    %1 = arith.addi %0, %c1_i32_0 : i32
    %c0_i32 = arith.constant 0 : i32
    %2 = arith.minsi %1, %c0_i32 : i32
    %c0_i32_1 = arith.constant 0 : i32
    %c0_i32_2 = arith.constant 0 : i32
    return %arg0, %c0_i32_1, %2 : i32, i32, i32
  }
  func.func @transform_6(%arg0: i32, %arg1: i32) -> (i32, i32, i32) {
    %c0_i32 = arith.constant 0 : i32
    %c0_i32_0 = arith.constant 0 : i32
    return %arg0, %c0_i32, %arg1 : i32, i32, i32
  }
  func.func @transform_7(%arg0: i32, %arg1: i32) -> (i32, i32, i32, i32) {
    %c0_i32 = arith.constant 0 : i32
    %c0_i32_0 = arith.constant 0 : i32
    %c0_i32_1 = arith.constant 0 : i32
    %c0_i32_2 = arith.constant 0 : i32
    return %arg0, %c0_i32, %c0_i32_0, %c0_i32_1 : i32, i32, i32, i32
  }
  func.func @transform_8(%arg0: i32, %arg1: i32) -> (i32, i32) {
    %c0_i32 = arith.constant 0 : i32
    %c0_i32_0 = arith.constant 0 : i32
    %c0_i32_1 = arith.constant 0 : i32
    return %c0_i32, %c0_i32_0 : i32, i32
  }
  func.func @transform_9(%arg0: i32, %arg1: i32) -> (i32, i32) {
    %c0_i32 = arith.constant 0 : i32
    %c0_i32_0 = arith.constant 0 : i32
    %c0_i32_1 = arith.constant 0 : i32
    return %c0_i32, %c0_i32_0 : i32, i32
  }
  func.func @transform_10(%arg0: i32, %arg1: i32) -> (i32, i32, i32, i32) {
    %c0_i32 = arith.constant 0 : i32
    %c0_i32_0 = arith.constant 0 : i32
    %c0_i32_1 = arith.constant 0 : i32
    %c0_i32_2 = arith.constant 0 : i32
    %c0_i32_3 = arith.constant 0 : i32
    return %c0_i32, %c0_i32_0, %c0_i32_1, %c0_i32_2 : i32, i32, i32, i32
  }
  func.func @transform_11(%arg0: i32, %arg1: i32) -> (i32, i32, i32) {
    %c0_i32 = arith.constant 0 : i32
    %c0_i32_0 = arith.constant 0 : i32
    %c0_i32_1 = arith.constant 0 : i32
    %c0_i32_2 = arith.constant 0 : i32
    return %c0_i32, %c0_i32_0, %c0_i32_1 : i32, i32, i32
  }
  func.func @transform_12(%arg0: i32, %arg1: i32) -> (i32, i32, i32) {
    %c0_i32 = arith.constant 0 : i32
    %c0_i32_0 = arith.constant 0 : i32
    %c0_i32_1 = arith.constant 0 : i32
    %c0_i32_2 = arith.constant 0 : i32
    return %c0_i32, %c0_i32_0, %c0_i32_1 : i32, i32, i32
  }
  func.func @transform_13(%arg0: i32, %arg1: i32) -> (i32, i32) {
    %c0_i32 = arith.constant 0 : i32
    %c0_i32_0 = arith.constant 0 : i32
    %c0_i32_1 = arith.constant 0 : i32
    return %c0_i32, %c0_i32_0 : i32, i32
  }
  func.func @transform_14(%arg0: i32, %arg1: i32) -> (i32, i32) {
    %c0_i32 = arith.constant 0 : i32
    %c0_i32_0 = arith.constant 0 : i32
    %c0_i32_1 = arith.constant 0 : i32
    return %c0_i32, %c0_i32_0 : i32, i32
  }
  func.func @transform_15(%arg0: i32, %arg1: i32) -> (i32, i32, i32) {
    %c0_i32 = arith.constant 0 : i32
    %c0_i32_0 = arith.constant 0 : i32
    return %arg0, %c0_i32, %arg1 : i32, i32, i32
  }
}

</mosaic_0001>

<bundles_post_ra>
// kernel: residual_coupling_block_forward.4
= control target key start
LH: loop header
LB: loop body
LE: loop exit
PB: predicated region body
PF: predicated region fallthrough
CT: control target
= control target key end

     0   :  { %s5806_s18 = smov 0   ;;  %s5808_s19 = smov 0   ;;  %s6535_s0 = inlined_call_operand.vmem [shape: f32[2,4,128], index: 0, kind: input, shape index: {}, may-alias: {0,1,2}]   ;;  %s6536_s1 = inlined_call_operand.vmem [shape: f32[2,4,128], index: 1, kind: input, shape index: {}, may-alias: {0,1,2}]   ;;  %s6537_s2 = inlined_call_operand.vmem [shape: f32[2,4,128], index: 2, kind: input, shape index: {}, may-alias: {0,1,2}]   ;;  %s6538_s3 = inlined_call_operand.vmem [shape: f32[2,1,128], index: 3, kind: input, shape index: {}, may-alias: {3,4,5}]   ;;  %s6539_s4 = inlined_call_operand.vmem [shape: f32[2,1,128], index: 4, kind: input, shape index: {}, may-alias: {3,4,5}]   ;;  %s6540_s5 = inlined_call_operand.vmem [shape: f32[2,1,128], index: 5, kind: input, shape index: {}, may-alias: {3,4,5}]   ;;  %s6541_s6 = inlined_call_operand.vmem [shape: f32[2,4,128], index: 6, kind: input, shape index: {}]   ;;  %s6542_s7 = inlined_call_operand.vmem [shape: f32[2,4,32,1], index: 7, kind: input, shape index: {}]   ;;  %s6543_s8 = inlined_call_operand.vmem [shape: bf16[16,4], index: 8, kind: input, shape index: {}]   ;;  %s6544_s9 = inlined_call_operand.vmem [shape: f32[16,1], index: 9, kind: input, shape index: {}]   ;;  %s6545_s10 = inlined_call_operand.vmem [shape: bf16[4,5,32,16], index: 10, kind: input, shape index: {}]   ;;  %s6546_s11 = inlined_call_operand.vmem [shape: bf16[4,32,16], index: 11, kind: input, shape index: {}]   ;;  %s6547_s12 = inlined_call_operand.vmem [shape: f32[4,32,1], index: 12, kind: input, shape index: {}]   ;;  %s6548_s13 = inlined_call_operand.vmem [shape: bf16[4,16], index: 13, kind: input, shape index: {}]   ;;  %s6549_s14 = inlined_call_operand.vmem [shape: f32[4,1], index: 14, kind: input, shape index: {}]   ;;  %s6550_s15 = inlined_call_operand.vmem [shape: f32[2,4,128], index: 15, kind: output, shape index: {}]  }
   0x1   :  { %s5810_s20 = smov 0  }
   0x2 LB: > { %s37_s21 = sadd.s32 1, %s5704_s19  ;;  %p4824_p0 = scmp.ge.s32.totalorder %s5708_s20, 1  ;;  %s5708_s20 = sphi %s5810_s20, %s25_s20   ;;  %s5704_s19 = sphi %s5808_s19, %s6563_s19   ;;  %s5700_s18 = sphi %s5806_s18, %s6562_s18  }
   0x3   : > { %p39_p1 = scmp.ge.s32.totalorder %s37_s21, 2  ;;  %p594_p2 = scmp.lt.s32.totalorder %s5708_s20, 3 }
   0x5   : > { %s6565_s21 = smov (%p39_p1, %s37_s21), 0  ;;  %p595_p3 = pnand %p4824_p0, %p594_p2 }
   0x6   : > { %p705_p4 = scmp.lt.s32.totalorder (!%p595_p3), %s5700_s18, 1  ;;  %v5710_v0 = vmov (!%p595_p3), 0.0   ;;  %v5711_v1 = vmov (!%p595_p3), 0   ;;  %v806_v2 = vld [vmem:[%s6544_s9] sm:$0xff] (!%p595_p3)  ;;  %vm5712_vm0 = vmmov (!%p595_p3), 0   ;;  %v807_v3 = vld [vmem:[%s6544_s9 + $0x8] sm:$0xff] (!%p595_p3)  ;;  %v921_v13 = vlaneseq (!%p595_p3) }
   0x7   : > { %598 = sbr.rel (%p595_p3) target bundleno = 3774 (0xebe), region = 80  ;;  %5165 = vmatprep.subr.bf16.mxu1 (!%p595_p3), %v5710_v0  ;;  %869 = vmatprep.mubr.bf16.mxu0 (!%p595_p3), %v5711_v1  ;;  %vm827_vm1 = vcmask (!%p595_p3), 1041408   ;;  %v5503_v11 = vld [vmem:[%s6543_s8] sm:$0xff] (!%p595_p3)   ;;  %vm823_vm2 = vcmask (!%p595_p3), 31744   ;;  %v5881_v34 = vld [vmem:[%s6545_s10 + $0x10] sm:$0xff] (!%p595_p3)   ;;  %vm976_vm3 = vcmask (!%p595_p3), 130048  }
   0x8   : > { %5167 = vmatprep.mubr.msk.bf16.mxu1 (!%p595_p3), %vm5712_vm0, %v5710_v0  ;;  %5501 = vset.pattern.permute.xlu0 (!%p595_p3), %v5711_v1  ;;  %v922_v14 = vshrl.u32 (!%p595_p3), %v921_v13, 7  ;;  %s5715_s16 = smov (!%p595_p3), 125   ;;  %s5716_s27 = smov (!%p595_p3), 124   ;;  %v1735_v51 = vld [vmem:[%s6547_s12] sm:$0xff] (!%p595_p3)  ;;  %v1736_v54 = vld [vmem:[%s6547_s12 + $0x8] sm:$0xff] (!%p595_p3)  ;;  %vm970_vm4 = vcmask (!%p595_p3), 1039360  }
   0x9   : > { %810 = vperm.xlu0 (!%p595_p3), %5501, %v806_v2   ;;  %5502 = vset.pattern.permute.xlu1 (!%p595_p3), %v5711_v1  ;;  %v5505_v59 = vld [vmem:[%s6545_s10 + $0x18] sm:$0xff] (!%p595_p3)   ;;  %vm1224_vm5 = vcmask (!%p595_p3), 1031168   ;;  %v5506_v62 = vld [vmem:[%s6545_s10] sm:$0xff] (!%p595_p3)   ;;  %vm1371_vm6 = vcmask (!%p595_p3), 1022976   ;;  %vm1518_vm7 = vcmask (!%p595_p3), 1014784   ;;  %vm1897_vm8 = vcmask (!%p595_p3), 15360  }
   0xa   : > { %v923_v18 = vsub.s32 (!%p595_p3), 0, %v922_v14  ;;  %s5718_s23 = smov (!%p595_p3), 123   ;;  %vm2361_vm9 = vcmask (!%p595_p3), 1006592   ;;  %vm2508_vm10 = vcmask (!%p595_p3), 998400   ;;  %vm3371_vm11 = vcmask (!%p595_p3), 990208   ;;  %s5724_s28 = smov (!%p595_p3), 119  }
   0xb   : > { %vm3518_vm12 = vcmask (!%p595_p3), 982016   ;;  %vm3918_vm13 = vcmask (!%p595_p3), 48128   ;;  %vm4228_vm14 = vcmask (!%p595_p3), 973824   ;;  %vm4321_vm15 = vcmask (!%p595_p3), 965632  }
   0xd   : > { %815 = vperm.xlu0 (!%p595_p3), %5501, %v807_v3  }
   0xe   : > { %s6567_s18 = smov (!%p705_p4, %s5700_s18), 1 }
   0xf   : > { %s5836_s24 = sshll.u32 %s6567_s18, 2  ;;  %s743_s30 = scalar_lea.vmem %s6538_s3, %s6567_s18 }
  0x10   : > { %s721_s29 = scalar_lea.vmem %s6536_s1, %s5836_s24  ;;  %s711_s17 = scalar_lea.vmem %s6535_s0, %s5836_s24  ;;  %v792_v15 = vld [vmem:[%s743_s30] sm:$0x1] }
  0x11   : > { %v799_v4 = vld [vmem:[%s721_s29] sm:$0xf]  ;;  %s731_s25 = scalar_lea.vmem %s6537_s2, %s5836_s24  ;;  %s761_s22 = scalar_lea.vmem %s6540_s5, %s6567_s18  ;;  %v794_v17 = vmul.f32 0.0, %v792_v15  ;;  %v5511_v15 = vld [vmem:[%s6545_s10 + $0x38] sm:$0xff]  }
  0x12   : > { %v802_v5 = vpack.c.bf16 %v799_v4, %v799_v4  ;;  %v798_v6 = vld [vmem:[%s711_s17] sm:$0xf]  ;;  %s5871_s26 = scalar_lea.vmem %s6539_s4, %s6567_s18  ;;  %s5713_s29 = smov 127   ;;  %v5507_v4 = vld [vmem:[%s6545_s10 + $0x8] sm:$0xff]  }
  0x13   : > { %v801_v7 = vpack.c.bf16 %v798_v6, %v798_v6  ;;  %v800_v8 = vld [vmem:[%s731_s25] sm:$0xf]  ;;  %v5873_v24 = vrot.slane %v794_v17, %v923_v18  ;;  %s6551_s30 = smov 126   ;;  %s5105_s17 = sshll.u32 %s6567_s18, 7 }
  0x14   : > { %4833 = vmatprep.subr.msk.bf16.mxu0 %vm827_vm1, %v802_v5  ;;  %v803_v9 = vpack.c.bf16 %v800_v8, %v800_v8  ;;  %v795_v19 = vld [vmem:[%s761_s22] sm:$0x1]  ;;  %s5920_s25 = scalar_lea.vmem %s6542_s7, %s5105_s17  ;;  %s5721_s22 = smov 121  }
  0x15   : > { %v829_v10 = vsel %vm827_vm1, %v801_v7, 0  ;;  %v797_v22 = vmul.f32 0.0, %v795_v19  ;;  %v5876_v30 = vld [vmem:[%s5871_s26] ss:$0 sm:$0xff]  ;;  %v1646_v49 = vld [vmem:[%s5920_s25 + $0x10] sm:$0xff]  ;;  %v1647_v52 = vld [vmem:[%s5920_s25 + $0x18] sm:$0xff] }
  0x16   : > { %838 = vmatpush1.bf16.msra.mxu0 %v829_v10  ;;  %v835_v12 = vsel %vm827_vm1, %v803_v9, 0  ;;  %v1644_v50 = vld [vmem:[%s5920_s25] sm:$0xff]  ;;  %v1645_v53 = vld [vmem:[%s5920_s25 + $0x8] sm:$0xff]  ;;  %s6560_s17 = smov 6  }
  0x17   : > { %5166 = vmatpush3.bf16.msra.mxu1 %v835_v12  ;;  %v5886_v40 = vrot.slane %v797_v22, %v923_v18  ;;  %v5508_v5 = vld [vmem:[%s6545_s10 + $0x20] sm:$0xff]   ;;  %v5510_v12 = vld [vmem:[%s6545_s10 + $0x30] sm:$0xff]   ;;  %v5513_v19 = vld [vmem:[%s6545_s10 + $0x48] sm:$0xff]  }
  0x18   : > { %v5512_v17 = vld [vmem:[%s6545_s10 + $0x40] sm:$0xff]  }
  0x19   : > { %4834 = vmatmul.mubr.msk.bf16.vlgmr.msra.gmra.mrb[0].mxu0 %vm823_vm2, %v5503_v11  ;;  %v6002_v22 = vld [vmem:[%s6546_s11] sm:$0xff]  }
  0x1a   : > { %5168 = vmatmul.mubr.msk.bf16.vlgmr.msra.gmra.mrb[0].mxu1 %vm823_vm2, %v5503_v11  ;;  %1015 = vmatprep.mubr.bf16.mxu0 %v5711_v1  ;;  %v5509_v11 = vld [vmem:[%s6545_s10 + $0x28] sm:$0xff]  }
  0x1b   : > { %5173 = vmatprep.mubr.msk.bf16.mxu1 %vm976_vm3, %v5881_v34 }
  0x88   : > { %v811_v16 = vpop.permute.xlu0 %810 }
  0x8c   : > { %v816_v20 = vpop.permute.xlu0 %815 }
  0xec   : > { %v871_v21 = vpop.f32.mrb[0].mxu0 }
  0xed   : > { %v872_v23 = vadd.f32 %v871_v21, %v811_v16  ;;  %v914_v25 = vpop.f32.mrb[0].mxu1  ;;  %v873_v26 = vpop.f32.mrb[1].mxu0 }
  0xee   : > { %v874_v27 = vadd.f32 %v873_v26, %v811_v16  ;;  %v5169_v28 = vpop.f32.mrb[1].mxu1  ;;  %v875_v29 = vpop.f32.mrb[2].mxu0  ;;  %v915_v39 = vadd.f32 %v914_v25, %v811_v16 }
  0xef   : > { %v876_v31 = vadd.f32 %v875_v29, %v816_v20  ;;  %v917_v32 = vpop.f32.mrb[2].mxu1  ;;  %v877_v33 = vpop.f32.mrb[3].mxu0  ;;  %v5884_v38 = vmul.f32 %v5873_v24, %v872_v23 }
  0xf0   : > { %v918_v35 = vadd.f32 %v917_v32, %v816_v20  ;;  %v878_v36 = vadd.f32 %v877_v33, %v816_v20  ;;  %v5170_v37 = vpop.f32.mrb[3].mxu1  ;;  %v5894_v42 = vmul.f32 %v5876_v30, %v874_v27  ;;  %v5907_v47 = vmul.f32 %v5886_v40, %v915_v39 }
  0xf1   : > { %v5889_v41 = vmul.f32 %v5873_v24, %v876_v31 }
  0xf2   : > { %v5897_v43 = vmul.f32 %v5876_v30, %v878_v36  ;;  %v5902_v45 = vmul.f32 %v5886_v40, %v918_v35 }
  0xf3   : > { %v939_v44 = vpack.c.bf16 %v5889_v41, %v5884_v38 }
  0xf4   : > { %v940_v46 = vpack.c.bf16 %v5897_v43, %v5894_v42  ;;  %v941_v48 = vpack.c.bf16 %v5902_v45, %v5907_v47 }
  0xf5   : > { %964 = vrot.lane.b32.xlu0 %v939_v44, %s5713_s29 }
  0xf6   : > { %966 = vrot.lane.b32.xlu1 %v940_v46, %s5713_s29 }
  0xf9   : > { %1222 = vrot.lane.b32.xlu0 %v941_v48, %s6551_s30 }
  0xfa   : > { %968 = vrot.lane.b32.xlu1 %v941_v48, %s5713_s29  ;;  %s6552_s29 = smov 2  }
  0xfd   : > { %1367 = vrot.lane.b32.xlu0 %v940_v46, %s5715_s16 }
  0xfe   : > { %1220 = vrot.lane.b32.xlu1 %v940_v46, %s6551_s30 }
 0x101   : > { %1365 = vrot.lane.b32.xlu0 %v939_v44, %s5715_s16 }
 0x102   : > { %1218 = vrot.lane.b32.xlu1 %v939_v44, %s6551_s30 }
 0x105   : > { %1516 = vrot.lane.b32.xlu0 %v941_v48, %s5716_s27 }
 0x106   : > { %1369 = vrot.lane.b32.xlu1 %v941_v48, %s5715_s16 }
 0x109   : > { %1660 = vperm.xlu0 %5501, %v1646_v49  }
 0x10a   : > { %1514 = vrot.lane.b32.xlu1 %v940_v46, %s5716_s27 }
 0x10d   : > { %1650 = vperm.xlu0 %5501, %v1644_v50  }
 0x10e   : > { %1512 = vrot.lane.b32.xlu1 %v939_v44, %s5716_s27 }
 0x111   : > { %1741 = vperm.xlu0 %5501, %v1735_v51  }
 0x112   : > { %1665 = vperm.xlu1 %5502, %v1647_v52  }
 0x116   : > { %1655 = vperm.xlu1 %5502, %v1645_v53  }
 0x11a   : > { %1746 = vperm.xlu1 %5502, %v1736_v54  }
 0x167   : > { %v965_v56 = vpop.permute.xlu0 %964 }
 0x168   : > { %v967_v55 = vpop.permute.xlu1 %966 }
 0x169   : > { %v971_v60 = vsel %vm970_vm4, %v965_v56, %v967_v55 }
 0x16b   : > { %v1223_v63 = vpop.permute.xlu0 %1222 }
 0x16c   : > { %v969_v57 = vpop.permute.xlu1 %968 }
 0x16d   : > { %5171 = vmatprep.subr.bf16.mxu1 %v969_v57  ;;  %v972_v58 = vsel %vm970_vm4, %v967_v55, %v969_v57 }
 0x16e   : > { %983 = vmatprep.subr.bf16.mxu0 %v972_v58  ;;  %5172 = vmatpush3.bf16.msra.mxu1 %v969_v57 }
 0x16f   : > { %984 = vmatpush1.bf16.msra.mxu0 %v971_v60  ;;  %5177 = vmatprep.subr.bf16.mxu1 %v941_v48  ;;  %v1368_v6 = vpop.permute.xlu0 %1367 }
 0x170   : > { %v1221_v61 = vpop.permute.xlu1 %1220  ;;  %1101 = vmatprep.subr.bf16.mxu0 %v940_v46 }
 0x171   : > { %5174 = vmatmul.mubr.msk.bf16.vlgmr.msra.gmra.mrb[4].mxu1 %vm976_vm3, %v5505_v59  ;;  %v1226_v2 = vsel %vm1224_vm5, %v1221_v61, %v1223_v63 }
 0x172   : > { %4842 = vmatmul.mubr.msk.bf16.vlgmr.msra.gmra.mrb[4].mxu0 %vm976_vm3, %v5881_v34  ;;  %5178 = vmatpush3.bf16.msra.mxu1 %v941_v48 }
 0x173   : > { %1102 = vmatpush1.bf16.msra.mxu0 %v939_v44  ;;  %5183 = vmatprep.subr.bf16.mxu1 %v1223_v63  ;;  %v1366_v10 = vpop.permute.xlu0 %1365 }
 0x174   : > { %1236 = vmatprep.subr.bf16.mxu0 %v1226_v2  ;;  %1025 = vmatprep.mubr.bf16.mxu0 %v5711_v1  ;;  %v1219_v3 = vpop.permute.xlu1 %1218  ;;  %v1372_v16 = vsel %vm1371_vm6, %v1366_v10, %v1368_v6 }
 0x175   : > { %5179 = vmatprep.mubr.msk.bf16.mxu1 %vm976_vm3, %v5506_v62  ;;  %v1225_v8 = vsel %vm1224_vm5, %v1219_v3, %v1221_v61 }
 0x177   : > { %v1517_v13 = vpop.permute.xlu0 %1516 }
 0x178   : > { %v1370_v7 = vpop.permute.xlu1 %1369 }
 0x179   : > { %v1373_v9 = vsel %vm1371_vm6, %v1368_v6, %v1370_v7 }
 0x17a   : > { %4843 = vmatmul.mubr.msk.bf16.gmra.mrb[8].mxu0 %vm976_vm3, %v5505_v59 }
 0x17b   : > { %1133 = vmatprep.mubr.bf16.mxu0 %v5711_v1 }
 0x17c   : > { %v1515_v14 = vpop.permute.xlu1 %1514 }
 0x17d   : > { %5180 = vmatmul.mubr.msk.bf16.vlgmr.msra.gmra.mrb[4].mxu1 %vm976_vm3, %v5507_v4  ;;  %v1520_v18 = vsel %vm1518_vm7, %v1515_v14, %v1517_v13 }
 0x17e   : > { %5184 = vmatpush3.bf16.msra.mxu1 %v1223_v63  ;;  %5185 = vmatprep.mubr.msk.bf16.mxu1 %vm976_vm3, %v5508_v5 }
 0x17f   : > { %5189 = vmatprep.subr.bf16.mxu1 %v1370_v7 }
 0x180   : > { %v1513_v20 = vpop.permute.xlu1 %1512 }
 0x181   : > { %v1519_v21 = vsel %vm1518_vm7, %v1513_v20, %v1515_v14 }
 0x182   : > { %4848 = vmatmul.mubr.msk.bf16.vlgmr.msra.gmra.mrb[4].mxu0 %vm976_vm3, %v5506_v62 }
 0x183   : > { %1237 = vmatpush1.bf16.msra.mxu0 %v1225_v8  ;;  %1143 = vmatprep.mubr.bf16.mxu0 %v5711_v1 }
 0x184   : > { %1383 = vmatprep.subr.bf16.mxu0 %v1373_v9 }
 0x188   : > { %v1661_v23 = vpop.permute.xlu0 %1660 }
 0x189   : > { %5186 = vmatmul.mubr.msk.bf16.vlgmr.msra.gmra.mrb[4].mxu1 %vm976_vm3, %v5509_v11 }
 0x18a   : > { %5190 = vmatpush3.bf16.msra.mxu1 %v1370_v7  ;;  %4849 = vmatmul.mubr.msk.bf16.gmra.mrb[8].mxu0 %vm976_vm3, %v5507_v4 }
 0x18b   : > { %5195 = vmatprep.subr.bf16.mxu1 %v1517_v13  ;;  %1268 = vmatprep.mubr.bf16.mxu0 %v5711_v1 }
 0x18c   : > { %5191 = vmatprep.mubr.msk.bf16.mxu1 %vm976_vm3, %v5510_v12  ;;  %v1651_v35 = vpop.permute.xlu0 %1650 }
 0x191   : > { %v1666_v28 = vpop.permute.xlu1 %1665 }
 0x192   : > { %4858 = vmatmul.mubr.msk.bf16.vlgmr.msra.gmra.mrb[4].mxu0 %vm976_vm3, %v5508_v5 }
 0x193   : > { %1384 = vmatpush1.bf16.msra.mxu0 %v1372_v16  ;;  %1278 = vmatprep.mubr.bf16.mxu0 %v5711_v1 }
 0x194   : > { %1530 = vmatprep.subr.bf16.mxu0 %v1520_v18 }
 0x195   : > { %5192 = vmatmul.mubr.msk.bf16.vlgmr.msra.gmra.mrb[4].mxu1 %vm976_vm3, %v5511_v15  ;;  %v1656_v36 = vpop.permute.xlu1 %1655 }
 0x196   : > { %5196 = vmatpush3.bf16.msra.mxu1 %v1517_v13  ;;  %5197 = vmatprep.mubr.msk.bf16.mxu1 %vm976_vm3, %v5512_v17 }
 0x19a   : > { %4859 = vmatmul.mubr.msk.bf16.gmra.mrb[8].mxu0 %vm976_vm3, %v5509_v11 }
 0x19b   : > { %1415 = vmatprep.mubr.bf16.mxu0 %v5711_v1 }
 0x1a1   : > { %5198 = vmatmul.mubr.msk.bf16.vlgmr.msra.gmra.mrb[4].mxu1 %vm976_vm3, %v5513_v19 }
 0x1a2   : > { %4868 = vmatmul.mubr.msk.bf16.vlgmr.msra.gmra.mrb[4].mxu0 %vm976_vm3, %v5510_v12  ;;  %5203 = vmatprep.mubr.msk.bf16.mxu1 %vm976_vm3, %v6002_v22  ;;  %v5515_v12 = vld [vmem:[%s6546_s11 + $0x8] sm:$0xff]  }
 0x1a3   : > { %1531 = vmatpush1.bf16.msra.mxu0 %v1519_v21  ;;  %1425 = vmatprep.mubr.bf16.mxu0 %v5711_v1 }
 0x1aa   : > { %4869 = vmatmul.mubr.msk.bf16.gmra.mrb[8].mxu0 %vm976_vm3, %v5511_v15 }
 0x1ab   : > { %1562 = vmatprep.mubr.bf16.mxu0 %v5711_v1 }
 0x1b2   : > { %4878 = vmatmul.mubr.msk.bf16.vlgmr.msra.gmra.mrb[4].mxu0 %vm976_vm3, %v5512_v17 }
 0x1b3   : > { %1572 = vmatprep.mubr.bf16.mxu0 %v5711_v1 }
 0x1ba   : > { %4879 = vmatmul.mubr.msk.bf16.gmra.mrb[8].mxu0 %vm976_vm3, %v5513_v19 }
 0x1bb   : > { %1807 = vmatprep.mubr.bf16.mxu0 %v5711_v1 }
 0x274   : > { %v5199_v25 = vpop.f32.mrb[4].mxu1 }
 0x275   : > { %v1676_v26 = vadd.f32 %v5199_v25, %v1661_v23  ;;  %v1617_v27 = vpop.f32.mrb[5].mxu1 }
 0x276   : > { %v5200_v29 = vpop.f32.mrb[6].mxu1  ;;  %v1670_v37 = vadd.f32 %v1651_v35, %v1617_v27 }
 0x277   : > { %v4884_v31 = vmul.f32 -1.442695, %v1676_v26  ;;  %v1679_v32 = vadd.f32 %v5200_v29, %v1666_v28  ;;  %v1620_v33 = vpop.f32.mrb[7].mxu1 }
 0x278   : > { %v1673_v44 = vadd.f32 %v1656_v36, %v1620_v33 }
 0x279   : > { %5552 = vpow2.f32 %v4884_v31  ;;  %v4887_v34 = vmul.f32 -1.442695, %v1679_v32 }
 0x27b   : > { %5554 = vpow2.f32 %v4887_v34 }
 0x27c   : > { %5556 = vtanh.f32 %v1670_v37 }
 0x283   : > { %v5553_v39 = vpop.eup %5552 }
 0x284   : > { %v1706_v46 = vadd.f32 1.0, %v5553_v39 }
 0x285   : > { %v5555_v48 = vpop.eup %5554  ;;  %v1564_v49 = vpop.f32.mrb[4].mxu0 }
 0x286   : > { %5558 = vrcp.f32 %v1706_v46  ;;  %v1709_v50 = vadd.f32 1.0, %v5555_v48  ;;  %v1566_v51 = vpop.f32.mrb[5].mxu0  ;;  %v5557_v57 = vpop.eup %5556  ;;  %v1668_v11 = vadd.f32 %v1651_v35, %v1564_v49 }
 0x287   : > { %5560 = vtanh.f32 %v1673_v44  ;;  %v1568_v52 = vpop.f32.mrb[6].mxu0  ;;  %v1669_v13 = vadd.f32 %v1651_v35, %v1566_v51  ;;  %v1742_v49 = vpop.permute.xlu0 %1741 }
 0x288   : > { %5562 = vrcp.f32 %v1709_v50  ;;  %v1570_v53 = vpop.f32.mrb[7].mxu0  ;;  %v1671_v14 = vadd.f32 %v1656_v36, %v1568_v52 }
 0x289   : > { %v1672_v15 = vadd.f32 %v1656_v36, %v1570_v53 }
 0x28d   : > { %v1574_v54 = vpop.f32.mrb[8].mxu0 }
 0x28e   : > { %v1674_v55 = vadd.f32 %v1661_v23, %v1574_v54  ;;  %v1576_v56 = vpop.f32.mrb[9].mxu0 }
 0x28f   : > { %v1675_v58 = vadd.f32 %v1661_v23, %v1576_v56  ;;  %v1578_v59 = vpop.f32.mrb[10].mxu0 }
 0x290   : > { %v5559_v60 = vpop.eup %5558  ;;  %v4882_v61 = vmul.f32 -1.442695, %v1674_v55  ;;  %v1677_v62 = vadd.f32 %v1666_v28, %v1578_v59  ;;  %v1580_v63 = vpop.f32.mrb[11].mxu0 }
 0x291   : > { %v5561_v2 = vpop.eup %5560  ;;  %v4883_v3 = vmul.f32 -1.442695, %v1675_v58  ;;  %v1678_v4 = vadd.f32 %v1666_v28, %v1580_v63  ;;  %v1724_v5 = vmul.f32 %v5559_v60, %v5557_v57  ;;  %v1747_v59 = vpop.permute.xlu1 %1746 }
 0x292   : > { %v5563_v6 = vpop.eup %5562  ;;  %5564 = vpow2.f32 %v4882_v61  ;;  %v4885_v7 = vmul.f32 -1.442695, %v1677_v62 }
 0x293   : > { %5566 = vpow2.f32 %v4883_v3  ;;  %v4886_v8 = vmul.f32 -1.442695, %v1678_v4  ;;  %v1727_v9 = vmul.f32 %v5563_v6, %v5561_v2 }
 0x294   : > { %5568 = vpow2.f32 %v4885_v7 }
 0x295   : > { %5570 = vpow2.f32 %v4886_v8  ;;  %v1734_v10 = vpack.c.bf16 %v1727_v9, %v1724_v5 }
 0x296   : > { %5572 = vtanh.f32 %v1668_v11 }
 0x297   : > { %5201 = vmatprep.subr.bf16.mxu1 %v1734_v10  ;;  %5574 = vtanh.f32 %v1669_v13 }
 0x298   : > { %5202 = vmatpush3.bf16.msra.mxu1 %v1734_v10  ;;  %5576 = vtanh.f32 %v1671_v14  ;;  %v6028_v10 = vld [vmem:[%s6545_s10 + $0x60] sm:$0xff]  }
 0x299   : > { %5578 = vtanh.f32 %v1672_v15 }
 0x29b   : > { %5204 = vmatmul.mubr.msk.bf16.vlgmr.msra.gmra.mrb[8].mxu1 %vm976_vm3, %v5515_v12 }
 0x29c   : > { %v5565_v16 = vpop.eup %5564  ;;  %1995 = vmatprep.mubr.bf16.mxu1 %v5711_v1 }
 0x29d   : > { %v5567_v17 = vpop.eup %5566  ;;  %v1704_v18 = vadd.f32 1.0, %v5565_v16 }
 0x29e   : > { %v5569_v19 = vpop.eup %5568  ;;  %v1705_v20 = vadd.f32 1.0, %v5567_v17 }
 0x29f   : > { %v5571_v21 = vpop.eup %5570  ;;  %5580 = vrcp.f32 %v1704_v18  ;;  %v1707_v23 = vadd.f32 1.0, %v5569_v19 }
 0x2a0   : > { %5582 = vrcp.f32 %v1705_v20  ;;  %v1708_v25 = vadd.f32 1.0, %v5571_v21  ;;  %v5573_v26 = vpop.eup %5572  ;;  %v4947_v21 = vld [vmem:[%s5920_s25 + $0x38] sm:$0xff] }
 0x2a1   : > { %5584 = vrcp.f32 %v1707_v23  ;;  %v5575_v27 = vpop.eup %5574  ;;  %v4944_v23 = vld [vmem:[%s5920_s25 + $0x20] sm:$0xff] }
 0x2a2   : > { %5586 = vrcp.f32 %v1708_v25  ;;  %v5577_v28 = vpop.eup %5576  ;;  %v4945_v25 = vld [vmem:[%s5920_s25 + $0x28] sm:$0xff] }
 0x2a3   : > { %v5579_v29 = vpop.eup %5578 }
 0x2a9   : > { %v5581_v31 = vpop.eup %5580 }
 0x2aa   : > { %v5583_v32 = vpop.eup %5582  ;;  %v1722_v33 = vmul.f32 %v5581_v31, %v5573_v26  ;;  %v4958_v26 = vld [vmem:[%s6547_s12 + $0x20] sm:$0xff] }
 0x2ab   : > { %v5585_v34 = vpop.eup %5584  ;;  %v1723_v35 = vmul.f32 %v5583_v32, %v5575_v27  ;;  %v4959_v27 = vld [vmem:[%s6547_s12 + $0x28] sm:$0xff] }
 0x2ac   : > { %v5587_v36 = vpop.eup %5586  ;;  %v1725_v37 = vmul.f32 %v5585_v34, %v5577_v28 }
 0x2ad   : > { %v1726_v39 = vmul.f32 %v5587_v36, %v5579_v29 }
 0x2ae   : > { %v1732_v44 = vpack.c.bf16 %v1725_v37, %v1722_v33 }
 0x2af   : > { %v1733_v46 = vpack.c.bf16 %v1726_v39, %v1723_v35  ;;  %v5517_v39 = vld [vmem:[%s6545_s10 + $0x68] sm:$0xff]  }
 0x2b1   : > { %1775 = vmatprep.subr.bf16.mxu0 %v1733_v46 }
 0x2b2   : > { %1776 = vmatpush1.bf16.msra.mxu0 %v1732_v44 }
 0x2b5   : > { %4890 = vmatmul.mubr.msk.bf16.vlgmr.msra.gmra.mrb[12].mxu0 %vm976_vm3, %v6002_v22 }
 0x2b6   : > { %1817 = vmatprep.mubr.bf16.mxu0 %v5711_v1 }
 0x2bd   : > { %4891 = vmatmul.mubr.msk.bf16.gmra.mrb[16].mxu0 %vm976_vm3, %v5515_v12 }
 0x2be   : > { %5209 = vmatprep.mubr.msk.bf16.mxu0 %vm976_vm3, %v6028_v10 }
 0x36e   : > { %v5205_v48 = vpop.f32.mrb[8].mxu1 }
 0x36f   : > { %v1862_v50 = vpop.f32.mrb[9].mxu1  ;;  %v5518_v48 = vld [vmem:[%s6545_s10 + $0x50] sm:$0xff]  }
 0x370   : > { %v1863_v51 = vadd.f32 %v1862_v50, %v1742_v49  ;;  %v5206_v52 = vpop.f32.mrb[10].mxu1 }
 0x371   : > { %v1865_v53 = vpop.f32.mrb[11].mxu1 }
 0x372   : > { %1889 = vrot.lane.b32.xlu0 %v1863_v51, %s6552_s29  ;;  %v1866_v62 = vadd.f32 %v1865_v53, %v1747_v59 }
 0x388   : > { %v1809_v54 = vpop.f32.mrb[12].mxu0 }
 0x389   : > { %v1810_v55 = vadd.f32 %v1809_v54, %v1742_v49  ;;  %v1811_v56 = vpop.f32.mrb[13].mxu0 }
 0x38a   : > { %v1812_v57 = vadd.f32 %v1811_v56, %v1742_v49  ;;  %v1813_v58 = vpop.f32.mrb[14].mxu0  ;;  %v5519_v56 = vld [vmem:[%s6545_s10 + $0x58] sm:$0xff]  }
 0x38b   : > { %v1815_v22 = vpop.f32.mrb[15].mxu0  ;;  %1885 = vrot.lane.b32.xlu0 %v1810_v55, %s6552_s29  ;;  %v1814_v61 = vadd.f32 %v1813_v58, %v1747_v59 }
 0x38c   : > { %v1816_v60 = vadd.f32 %v1815_v22, %v1747_v59  ;;  %1887 = vrot.lane.b32.xlu1 %v1812_v57, %s6552_s29  ;;  %v5520_v57 = vld [vmem:[%s6545_s10 + $0x70] sm:$0xff]  }
 0x38f   : > { %1893 = vrot.lane.b32.xlu0 %v1816_v60, %s6552_s29 }
 0x390   : > { %1891 = vrot.lane.b32.xlu1 %v1814_v61, %s6552_s29  ;;  %v6087_v28 = vpop.f32.mrb[16].mxu0 }
 0x391   : > { %v6089_v29 = vpop.f32.mrb[17].mxu0 }
 0x392   : > { %v6091_v31 = vpop.f32.mrb[18].mxu0 }
 0x393   : > { %v6093_v32 = vpop.f32.mrb[19].mxu0 }
 0x394   : > { %1895 = vrot.lane.b32.xlu1 %v1866_v62, %s6552_s29  ;;  %v5521_v62 = vld [vmem:[%s6545_s10 + $0x78] sm:$0xff]   ;;  %s5725_s29 = smov 118  }
 0x3e4   : > { %v1890_v63 = vpop.permute.xlu0 %1889 }
 0x3fd   : > { %v1886_v2 = vpop.permute.xlu0 %1885 }
 0x3fe   : > { %v1888_v3 = vpop.permute.xlu1 %1887  ;;  %v1908_v13 = vadd.f32 %v1886_v2, %v5884_v38 }
 0x3ff   : > { %v1898_v4 = vsel %vm1897_vm8, %v1886_v2, %v1888_v3  ;;  %v1899_v8 = vsel %vm1897_vm8, %v1888_v3, %v1890_v63  ;;  %v5522_v63 = vld [vmem:[%s6545_s10 + $0x80] sm:$0xff]   ;;  %v5523_v3 = vld [vmem:[%s6545_s10 + $0x88] sm:$0xff]  }
 0x400   : > { %v1909_v6 = vadd.f32 %v1898_v4, %v5894_v42  ;;  %v1910_v42 = vadd.f32 %v1899_v8, %v5907_v47  ;;  %v6050_v38 = vmul.f32 %v1908_v13, %v5873_v24  ;;  %v5525_v8 = vld [vmem:[%s6545_s10 + $0x98] sm:$0xff]  }
 0x401   : > { %v1894_v5 = vpop.permute.xlu0 %1893 }
 0x402   : > { %v1892_v7 = vpop.permute.xlu1 %1891  ;;  %v6037_v14 = vmul.f32 %v5876_v30, %v1909_v6  ;;  %v6053_v47 = vmul.f32 %v1910_v42, %v5886_v40  ;;  %v5524_v6 = vld [vmem:[%s6545_s10 + $0x90] sm:$0xff]  }
 0x403   : > { %v1900_v9 = vsel %vm1897_vm8, %v1892_v7, %v1894_v5  ;;  %v1911_v11 = vadd.f32 %v1892_v7, %v5889_v41 }
 0x404   : > { %v1912_v12 = vadd.f32 %v1900_v9, %v5897_v43 }
 0x405   : > { %v6044_v41 = vmul.f32 %v1911_v11, %v5873_v24 }
 0x406   : > { %v6040_v15 = vmul.f32 %v5876_v30, %v1912_v12  ;;  %v1896_v16 = vpop.permute.xlu1 %1895 }
 0x407   : > { %v1901_v17 = vsel %vm1897_vm8, %v1894_v5, %v1896_v16  ;;  %v1920_v19 = vpack.c.bf16 %v6044_v41, %v6050_v38 }
 0x408   : > { %v1921_v43 = vpack.c.bf16 %v6040_v15, %v6037_v14  ;;  %v1913_v18 = vadd.f32 %v1901_v17, %v5902_v45  ;;  %v4946_v45 = vld [vmem:[%s5920_s25 + $0x30] sm:$0xff] }
 0x40a   : > { %v6056_v30 = vmul.f32 %v1913_v18, %v5886_v40  ;;  %1948 = vrot.lane.b32.xlu0 %v1921_v43, %s5715_s16 }
 0x40c   : > { %v1922_v20 = vpack.c.bf16 %v6056_v30, %v6053_v47 }
 0x40e   : > { %1950 = vrot.lane.b32.xlu1 %v1922_v20, %s5715_s16  ;;  %1946 = vrot.lane.b32.xlu0 %v1920_v19, %s5715_s16  ;;  %s5719_s16 = smov 122  }
 0x412   : > { %2077 = vrot.lane.b32.xlu1 %v1921_v43, %s6551_s30  ;;  %2079 = vrot.lane.b32.xlu0 %v1922_v20, %s6551_s30 }
 0x416   : > { %2075 = vrot.lane.b32.xlu1 %v1920_v19, %s6551_s30  ;;  %2211 = vrot.lane.b32.xlu0 %v1921_v43, %s5716_s27  ;;  %s6554_s30 = smov 4  }
 0x41a   : > { %2213 = vrot.lane.b32.xlu1 %v1922_v20, %s5716_s27  ;;  %2209 = vrot.lane.b32.xlu0 %v1920_v19, %s5716_s27 }
 0x41e   : > { %2357 = vrot.lane.b32.xlu1 %v1921_v43, %s5718_s23  ;;  %2359 = vrot.lane.b32.xlu0 %v1922_v20, %s5718_s23 }
 0x422   : > { %2355 = vrot.lane.b32.xlu1 %v1920_v19, %s5718_s23  ;;  %2504 = vrot.lane.b32.xlu0 %v1921_v43, %s5719_s16 }
 0x426   : > { %2506 = vrot.lane.b32.xlu1 %v1922_v20, %s5719_s16  ;;  %2502 = vrot.lane.b32.xlu0 %v1920_v19, %s5719_s16 }
 0x42a   : > { %2651 = vperm.xlu1 %5502, %v4946_v45   ;;  %2656 = vperm.xlu0 %5501, %v4947_v21  }
 0x42e   : > { %2641 = vperm.xlu1 %5502, %v4944_v23   ;;  %2646 = vperm.xlu0 %5501, %v4945_v25  }
 0x432   : > { %2734 = vperm.xlu1 %5502, %v4958_v26   ;;  %2739 = vperm.xlu0 %5501, %v4959_v27  }
 0x47c   : > { %v1949_v33 = vpop.permute.xlu0 %1948 }
 0x480   : > { %v1951_v34 = vpop.permute.xlu1 %1950  ;;  %v1947_v35 = vpop.permute.xlu0 %1946 }
 0x481   : > { %v1952_v36 = vsel %vm1371_vm6, %v1947_v35, %v1949_v33  ;;  %5207 = vmatprep.subr.bf16.mxu0 %v1951_v34  ;;  %v1953_v37 = vsel %vm1371_vm6, %v1949_v33, %v1951_v34 }
 0x482   : > { %1963 = vmatprep.subr.bf16.mxu1 %v1953_v37  ;;  %5208 = vmatpush3.bf16.msra.mxu0 %v1951_v34 }
 0x483   : > { %1964 = vmatpush1.bf16.msra.mxu1 %v1952_v36 }
 0x484   : > { %v2078_v44 = vpop.permute.xlu1 %2077  ;;  %v2080_v46 = vpop.permute.xlu0 %2079 }
 0x485   : > { %5210 = vmatmul.mubr.msk.bf16.vlgmr.msra.gmra.mrb[20].mxu0 %vm976_vm3, %v5517_v39  ;;  %5213 = vmatprep.subr.bf16.mxu0 %v2080_v46  ;;  %v2082_v49 = vsel %vm1224_vm5, %v2078_v44, %v2080_v46 }
 0x486   : > { %4904 = vmatmul.mubr.msk.bf16.vlgmr.msra.gmra.mrb[12].mxu1 %vm976_vm3, %v6028_v10  ;;  %2092 = vmatprep.subr.bf16.mxu1 %v2082_v49 }
 0x487   : > { %5214 = vmatpush3.bf16.msra.mxu0 %v2080_v46  ;;  %2005 = vmatprep.mubr.bf16.mxu1 %v5711_v1 }
 0x488   : > { %v2076_v50 = vpop.permute.xlu1 %2075  ;;  %v2212_v51 = vpop.permute.xlu0 %2211  ;;  %5215 = vmatprep.mubr.msk.bf16.mxu0 %vm976_vm3, %v5518_v48 }
 0x489   : > { %v2081_v52 = vsel %vm1224_vm5, %v2076_v50, %v2078_v44 }
 0x48a   : > { %2093 = vmatpush1.bf16.msra.mxu1 %v2081_v52 }
 0x48c   : > { %v2214_v53 = vpop.permute.xlu1 %2213  ;;  %v2210_v54 = vpop.permute.xlu0 %2209 }
 0x48d   : > { %5219 = vmatprep.subr.bf16.mxu0 %v2214_v53  ;;  %v2216_v55 = vsel %vm1518_vm7, %v2212_v51, %v2214_v53  ;;  %v2215_v22 = vsel %vm1518_vm7, %v2210_v54, %v2212_v51 }
 0x48e   : > { %4905 = vmatmul.mubr.msk.bf16.gmra.mrb[16].mxu1 %vm976_vm3, %v5517_v39  ;;  %2226 = vmatprep.subr.bf16.mxu1 %v2216_v55 }
 0x48f   : > { %2124 = vmatprep.mubr.bf16.mxu1 %v5711_v1 }
 0x490   : > { %v2360_v58 = vpop.permute.xlu0 %2359  ;;  %v2358_v59 = vpop.permute.xlu1 %2357 }
 0x491   : > { %5216 = vmatmul.mubr.msk.bf16.vlgmr.msra.gmra.mrb[20].mxu0 %vm976_vm3, %v5519_v56  ;;  %v2363_v60 = vsel %vm2361_vm9, %v2358_v59, %v2360_v58 }
 0x492   : > { %5220 = vmatpush3.bf16.msra.mxu0 %v2214_v53  ;;  %5221 = vmatprep.mubr.msk.bf16.mxu0 %vm976_vm3, %v5520_v57 }
 0x493   : > { %5225 = vmatprep.subr.bf16.mxu0 %v2360_v58 }
 0x494   : > { %v2356_v61 = vpop.permute.xlu1 %2355  ;;  %v2505_v5 = vpop.permute.xlu0 %2504 }
 0x495   : > { %v2362_v4 = vsel %vm2361_vm9, %v2356_v61, %v2358_v59 }
 0x496   : > { %4910 = vmatmul.mubr.msk.bf16.vlgmr.msra.gmra.mrb[12].mxu1 %vm976_vm3, %v5518_v48 }
 0x497   : > { %2227 = vmatpush1.bf16.msra.mxu1 %v2215_v22  ;;  %2134 = vmatprep.mubr.bf16.mxu1 %v5711_v1 }
 0x498   : > { %2373 = vmatprep.subr.bf16.mxu1 %v2363_v60  ;;  %v2507_v2 = vpop.permute.xlu1 %2506  ;;  %v2503_v9 = vpop.permute.xlu0 %2502 }
 0x499   : > { %v2510_v7 = vsel %vm2508_vm10, %v2505_v5, %v2507_v2  ;;  %v2509_v10 = vsel %vm2508_vm10, %v2503_v9, %v2505_v5 }
 0x49d   : > { %5222 = vmatmul.mubr.msk.bf16.vlgmr.msra.gmra.mrb[20].mxu0 %vm976_vm3, %v5521_v62 }
 0x49e   : > { %5226 = vmatpush3.bf16.msra.mxu0 %v2360_v58  ;;  %4911 = vmatmul.mubr.msk.bf16.gmra.mrb[16].mxu1 %vm976_vm3, %v5519_v56 }
 0x49f   : > { %5231 = vmatprep.subr.bf16.mxu0 %v2507_v2  ;;  %2258 = vmatprep.mubr.bf16.mxu1 %v5711_v1 }
 0x4a0   : > { %5227 = vmatprep.mubr.msk.bf16.mxu0 %vm976_vm3, %v5522_v63 }
 0x4a6   : > { %4920 = vmatmul.mubr.msk.bf16.vlgmr.msra.gmra.mrb[12].mxu1 %vm976_vm3, %v5520_v57 }
 0x4a7   : > { %2374 = vmatpush1.bf16.msra.mxu1 %v2362_v4  ;;  %2268 = vmatprep.mubr.bf16.mxu1 %v5711_v1 }
 0x4a8   : > { %2520 = vmatprep.subr.bf16.mxu1 %v2510_v7 }
 0x4a9   : > { %5228 = vmatmul.mubr.msk.bf16.vlgmr.msra.gmra.mrb[20].mxu0 %vm976_vm3, %v5523_v3  ;;  %v2652_v11 = vpop.permute.xlu1 %2651  ;;  %v2657_v16 = vpop.permute.xlu0 %2656 }
 0x4aa   : > { %5232 = vmatpush3.bf16.msra.mxu0 %v2507_v2  ;;  %5233 = vmatprep.mubr.msk.bf16.mxu0 %vm976_vm3, %v5524_v6 }
 0x4ad   : > { %v2642_v45 = vpop.permute.xlu1 %2641  ;;  %v2647_v23 = vpop.permute.xlu0 %2646 }
 0x4ae   : > { %4921 = vmatmul.mubr.msk.bf16.gmra.mrb[16].mxu1 %vm976_vm3, %v5521_v62 }
 0x4af   : > { %2405 = vmatprep.mubr.bf16.mxu1 %v5711_v1 }
 0x4b5   : > { %5234 = vmatmul.mubr.msk.bf16.vlgmr.msra.gmra.mrb[20].mxu0 %vm976_vm3, %v5525_v8 }
 0x4b6   : > { %4930 = vmatmul.mubr.msk.bf16.vlgmr.msra.gmra.mrb[12].mxu1 %vm976_vm3, %v5522_v63  ;;  %2800 = vmatprep.mubr.bf16.mxu0 %v5711_v1 }
 0x4b7   : > { %2521 = vmatpush1.bf16.msra.mxu1 %v2509_v10  ;;  %2415 = vmatprep.mubr.bf16.mxu1 %v5711_v1 }
 0x4be   : > { %4931 = vmatmul.mubr.msk.bf16.gmra.mrb[16].mxu1 %vm976_vm3, %v5523_v3 }
 0x4bf   : > { %2552 = vmatprep.mubr.bf16.mxu1 %v5711_v1 }
 0x4c6   : > { %4940 = vmatmul.mubr.msk.bf16.vlgmr.msra.gmra.mrb[12].mxu1 %vm976_vm3, %v5524_v6 }
 0x4c7   : > { %2562 = vmatprep.mubr.bf16.mxu1 %v5711_v1 }
 0x4ce   : > { %4941 = vmatmul.mubr.msk.bf16.gmra.mrb[16].mxu1 %vm976_vm3, %v5525_v8 }
 0x588   : > { %v5235_v12 = vpop.f32.mrb[20].mxu0 }
 0x589   : > { %v2667_v13 = vadd.f32 %v5235_v12, %v2652_v11  ;;  %v2607_v42 = vpop.f32.mrb[21].mxu0 }
 0x58a   : > { %v5236_v17 = vpop.f32.mrb[22].mxu0  ;;  %v2661_v21 = vadd.f32 %v2642_v45, %v2607_v42 }
 0x58b   : > { %v4950_v43 = vmul.f32 -1.442695, %v2667_v13  ;;  %v2670_v18 = vadd.f32 %v5236_v17, %v2657_v16  ;;  %v2610_v19 = vpop.f32.mrb[23].mxu0 }
 0x58c   : > { %v2664_v26 = vadd.f32 %v2647_v23, %v2610_v19 }
 0x58d   : > { %5588 = vpow2.f32 %v4950_v43  ;;  %v4953_v20 = vmul.f32 -1.442695, %v2670_v18 }
 0x58f   : > { %5590 = vpow2.f32 %v4953_v20 }
 0x590   : > { %5592 = vtanh.f32 %v2661_v21 }
 0x597   : > { %v5589_v25 = vpop.eup %5588 }
 0x598   : > { %v2697_v27 = vadd.f32 1.0, %v5589_v25 }
 0x599   : > { %v5591_v33 = vpop.eup %5590  ;;  %v2554_v34 = vpop.f32.mrb[12].mxu1 }
 0x59a   : > { %5594 = vrcp.f32 %v2697_v27  ;;  %v2700_v35 = vadd.f32 1.0, %v5591_v33  ;;  %v2556_v36 = vpop.f32.mrb[13].mxu1  ;;  %v5593_v49 = vpop.eup %5592  ;;  %v2659_v2 = vadd.f32 %v2642_v45, %v2554_v34  ;;  %v5526_v34 = vld [vmem:[%s6546_s11 + $0x10] sm:$0xff]  }
 0x59b   : > { %5596 = vtanh.f32 %v2664_v26  ;;  %v2558_v37 = vpop.f32.mrb[14].mxu1  ;;  %v2660_v3 = vadd.f32 %v2642_v45, %v2556_v36  ;;  %v2735_v36 = vpop.permute.xlu1 %2734 }
 0x59c   : > { %5598 = vrcp.f32 %v2700_v35  ;;  %v2560_v39 = vpop.f32.mrb[15].mxu1  ;;  %v2662_v4 = vadd.f32 %v2647_v23, %v2558_v37  ;;  %v5527_v35 = vld [vmem:[%s6546_s11 + $0x18] sm:$0xff]  }
 0x59d   : > { %v2663_v5 = vadd.f32 %v2647_v23, %v2560_v39 }
 0x5a1   : > { %v2564_v44 = vpop.f32.mrb[16].mxu1 }
 0x5a2   : > { %v2665_v46 = vadd.f32 %v2652_v11, %v2564_v44  ;;  %v2566_v48 = vpop.f32.mrb[17].mxu1 }
 0x5a3   : > { %v2666_v50 = vadd.f32 %v2652_v11, %v2566_v48  ;;  %v2568_v51 = vpop.f32.mrb[18].mxu1 }
 0x5a4   : > { %v5595_v52 = vpop.eup %5594  ;;  %v4948_v53 = vmul.f32 -1.442695, %v2665_v46  ;;  %v2668_v54 = vadd.f32 %v2657_v16, %v2568_v51  ;;  %v2570_v55 = vpop.f32.mrb[19].mxu1 }
 0x5a5   : > { %v5597_v56 = vpop.eup %5596  ;;  %v4949_v57 = vmul.f32 -1.442695, %v2666_v50  ;;  %v2669_v58 = vadd.f32 %v2657_v16, %v2570_v55  ;;  %v2715_v59 = vmul.f32 %v5595_v52, %v5593_v49  ;;  %v2740_v50 = vpop.permute.xlu0 %2739 }
 0x5a6   : > { %v5599_v22 = vpop.eup %5598  ;;  %5600 = vpow2.f32 %v4948_v53  ;;  %v4951_v60 = vmul.f32 -1.442695, %v2668_v54 }
 0x5a7   : > { %5602 = vpow2.f32 %v4949_v57  ;;  %v4952_v61 = vmul.f32 -1.442695, %v2669_v58  ;;  %v2718_v62 = vmul.f32 %v5599_v22, %v5597_v56 }
 0x5a8   : > { %5604 = vpow2.f32 %v4951_v60 }
 0x5a9   : > { %5606 = vpow2.f32 %v4952_v61  ;;  %v2726_v63 = vpack.c.bf16 %v2718_v62, %v2715_v59 }
 0x5aa   : > { %5608 = vtanh.f32 %v2659_v2 }
 0x5ab   : > { %5610 = vtanh.f32 %v2660_v3 }
 0x5ac   : > { %5612 = vtanh.f32 %v2662_v4  ;;  %v6191_v4 = vld [vmem:[%s6545_s10 + $0xb0] sm:$0xff]  }
 0x5ad   : > { %5614 = vtanh.f32 %v2663_v5  ;;  %5245 = vmatprep.mubr.msk.bf16.mxu1 %vm976_vm3, %v6191_v4 }
 0x5b0   : > { %v5601_v6 = vpop.eup %5600 }
 0x5b1   : > { %v5603_v7 = vpop.eup %5602  ;;  %v2695_v8 = vadd.f32 1.0, %v5601_v6 }
 0x5b2   : > { %v5605_v9 = vpop.eup %5604  ;;  %v2696_v10 = vadd.f32 1.0, %v5603_v7 }
 0x5b3   : > { %v5607_v11 = vpop.eup %5606  ;;  %5616 = vrcp.f32 %v2695_v8  ;;  %v2698_v12 = vadd.f32 1.0, %v5605_v9 }
 0x5b4   : > { %5618 = vrcp.f32 %v2696_v10  ;;  %v2699_v13 = vadd.f32 1.0, %v5607_v11  ;;  %v5609_v42 = vpop.eup %5608 }
 0x5b5   : > { %5620 = vrcp.f32 %v2698_v12  ;;  %v5611_v16 = vpop.eup %5610 }
 0x5b6   : > { %5622 = vrcp.f32 %v2699_v13  ;;  %v5613_v17 = vpop.eup %5612 }
 0x5b7   : > { %v5615_v43 = vpop.eup %5614 }
 0x5bd   : > { %v5617_v18 = vpop.eup %5616 }
 0x5be   : > { %v5619_v19 = vpop.eup %5618  ;;  %v2713_v20 = vmul.f32 %v5617_v18, %v5609_v42 }
 0x5bf   : > { %v5621_v45 = vpop.eup %5620  ;;  %v2714_v21 = vmul.f32 %v5619_v19, %v5611_v16 }
 0x5c0   : > { %v5623_v23 = vpop.eup %5622  ;;  %v2716_v25 = vmul.f32 %v5621_v45, %v5613_v17  ;;  %v5020_v45 = vld [vmem:[%s5920_s25 + $0x50] sm:$0xff] }
 0x5c1   : > { %v2717_v26 = vmul.f32 %v5623_v23, %v5615_v43  ;;  %v6206_v43 = vld [vmem:[%s5871_s26] ss:$0 sm:$0xff] }
 0x5c2   : > { %v2724_v27 = vpack.c.bf16 %v2716_v25, %v2713_v20  ;;  %v5018_v23 = vld [vmem:[%s5920_s25 + $0x40] sm:$0xff]  ;;  %v5019_v25 = vld [vmem:[%s5920_s25 + $0x48] sm:$0xff] }
 0x5c3   : > { %v2725_v33 = vpack.c.bf16 %v2717_v26, %v2714_v21  ;;  %v5021_v21 = vld [vmem:[%s5920_s25 + $0x58] sm:$0xff]  ;;  %v5032_v26 = vld [vmem:[%s6547_s12 + $0x40] sm:$0xff] }
 0x5c5   : > { %2768 = vmatprep.subr.bf16.mxu0 %v2725_v33 }
 0x5c6   : > { %2769 = vmatpush1.bf16.msra.mxu0 %v2724_v27  ;;  %v5033_v27 = vld [vmem:[%s6547_s12 + $0x48] sm:$0xff] }
 0x5c7   : > { %5237 = vmatprep.subr.bf16.mxu0 %v2726_v63 }
 0x5c9   : > { %4964 = vmatmul.mubr.msk.bf16.vlgmr.msra.gmra.mrb[24].mxu0 %vm976_vm3, %v5526_v34 }
 0x5ca   : > { %5238 = vmatpush3.bf16.msra.mxu0 %v2726_v63  ;;  %2810 = vmatprep.mubr.bf16.mxu0 %v5711_v1 }
 0x5d1   : > { %4965 = vmatmul.mubr.msk.bf16.gmra.mrb[28].mxu0 %vm976_vm3, %v5527_v35 }
 0x5d2   : > { %5239 = vmatprep.mubr.msk.bf16.mxu0 %vm976_vm3, %v5526_v34 }
 0x5d9   : > { %5240 = vmatmul.mubr.msk.bf16.vlgmr.msra.gmra.mrb[32].mxu0 %vm976_vm3, %v5527_v35 }
 0x5da   : > { %3005 = vmatprep.mubr.bf16.mxu0 %v5711_v1 }
 0x69c   : > { %v2802_v37 = vpop.f32.mrb[24].mxu0 }
 0x69d   : > { %v2803_v39 = vadd.f32 %v2802_v37, %v2735_v36  ;;  %v2804_v44 = vpop.f32.mrb[25].mxu0  ;;  %v5530_v37 = vld [vmem:[%s6545_s10 + $0xa0] sm:$0xff]  }
 0x69e   : > { %v2805_v46 = vadd.f32 %v2804_v44, %v2735_v36  ;;  %v2806_v48 = vpop.f32.mrb[26].mxu0 }
 0x69f   : > { %v2808_v49 = vpop.f32.mrb[27].mxu0  ;;  %2896 = vrot.lane.b32.xlu1 %v2803_v39, %s6554_s30  ;;  %v2807_v51 = vadd.f32 %v2806_v48, %v2740_v50 }
 0x6a0   : > { %2898 = vrot.lane.b32.xlu0 %v2805_v46, %s6554_s30  ;;  %v2809_v61 = vadd.f32 %v2808_v49, %v2740_v50 }
 0x6a4   : > { %v6176_v52 = vpop.f32.mrb[28].mxu0  ;;  %2902 = vrot.lane.b32.xlu0 %v2807_v51, %s6554_s30 }
 0x6a5   : > { %v6179_v53 = vpop.f32.mrb[29].mxu0 }
 0x6a6   : > { %v6181_v54 = vpop.f32.mrb[30].mxu0 }
 0x6a7   : > { %v6183_v55 = vpop.f32.mrb[31].mxu0 }
 0x6ac   : > { %v5241_v56 = vpop.f32.mrb[32].mxu0 }
 0x6ad   : > { %v2855_v57 = vpop.f32.mrb[33].mxu0 }
 0x6ae   : > { %v2856_v58 = vadd.f32 %v2855_v57, %v2735_v36  ;;  %v5242_v59 = vpop.f32.mrb[34].mxu0  ;;  %v5529_v36 = vld [vmem:[%s6545_s10 + $0xb8] sm:$0xff]  }
 0x6af   : > { %v2858_v22 = vpop.f32.mrb[35].mxu0  ;;  %v5531_v59 = vld [vmem:[%s6545_s10 + $0xa8] sm:$0xff]  }
 0x6b0   : > { %v2859_v60 = vadd.f32 %v2858_v22, %v2740_v50  ;;  %2900 = vrot.lane.b32.xlu1 %v2856_v58, %s6554_s30  ;;  %v5532_v22 = vld [vmem:[%s6545_s10 + $0xc0] sm:$0xff]  }
 0x6b2   : > { %2906 = vrot.lane.b32.xlu0 %v2859_v60, %s6554_s30 }
 0x6b4   : > { %2904 = vrot.lane.b32.xlu1 %v2809_v61, %s6554_s30  ;;  %s6556_s30 = smov 6  }
 0x711   : > { %v2897_v63 = vpop.permute.xlu1 %2896 }
 0x712   : > { %v2899_v62 = vpop.permute.xlu0 %2898  ;;  %v2918_v17 = vadd.f32 %v2897_v63, %v6050_v38 }
 0x713   : > { %v2908_v5 = vsel %vm823_vm2, %v2897_v63, %v2899_v62 }
 0x714   : > { %v2919_v7 = vadd.f32 %v2908_v5, %v6037_v14  ;;  %v5534_v5 = vld [vmem:[%s6545_s10 + $0xd0] sm:$0xff]  }
 0x716   : > { %v2903_v2 = vpop.permute.xlu0 %2902  ;;  %v6209_v14 = vmul.f32 %v6206_v43, %v2919_v7  ;;  %v5535_v7 = vld [vmem:[%s6545_s10 + $0xd8] sm:$0xff]  }
 0x717   : > { %v2921_v13 = vadd.f32 %v2903_v2, %v6044_v41 }
 0x722   : > { %v2901_v3 = vpop.permute.xlu1 %2900 }
 0x723   : > { %v2909_v6 = vsel %vm823_vm2, %v2899_v62, %v2901_v3  ;;  %v5533_v3 = vld [vmem:[%s6545_s10 + $0xc8] sm:$0xff]  }
 0x724   : > { %v2920_v8 = vadd.f32 %v2909_v6, %v6053_v47  ;;  %v2907_v9 = vpop.permute.xlu0 %2906 }
 0x726   : > { %v2905_v10 = vpop.permute.xlu1 %2904  ;;  %v6212_v47 = vmul.f32 %v2920_v8, %v5886_v40 }
 0x727   : > { %v2910_v11 = vsel %vm823_vm2, %v2903_v2, %v2905_v10  ;;  %v2911_v12 = vsel %vm823_vm2, %v2905_v10, %v2907_v9  ;;  %v5536_v9 = vld [vmem:[%s6545_s10 + $0xe0] sm:$0xff]  }
 0x728   : > { %v2922_v42 = vadd.f32 %v2910_v11, %v6040_v15  ;;  %v2923_v16 = vadd.f32 %v2911_v12, %v6056_v30  ;;  %v6221_v15 = vmul.f32 %v2921_v13, %v5873_v24  ;;  %v6228_v30 = vmul.f32 %v2918_v17, %v5873_v24  ;;  %v5537_v12 = vld [vmem:[%s6545_s10 + $0xe8] sm:$0xff]  }
 0x72a   : > { %v6215_v18 = vmul.f32 %v6206_v43, %v2922_v42  ;;  %v6218_v19 = vmul.f32 %v2923_v16, %v5886_v40  ;;  %v2930_v20 = vpack.c.bf16 %v6221_v15, %v6228_v30 }
 0x72c   : > { %v2931_v41 = vpack.c.bf16 %v6215_v18, %v6209_v14  ;;  %v2932_v38 = vpack.c.bf16 %v6218_v19, %v6212_v47 }
 0x72e   : > { %2958 = vrot.lane.b32.xlu1 %v2931_v41, %s5718_s23  ;;  %2960 = vrot.lane.b32.xlu0 %v2932_v38, %s5718_s23 }
 0x732   : > { %2956 = vrot.lane.b32.xlu1 %v2930_v20, %s5718_s23  ;;  %3087 = vrot.lane.b32.xlu0 %v2931_v41, %s5716_s27  ;;  %s5722_s23 = smov 120  }
 0x736   : > { %3089 = vrot.lane.b32.xlu1 %v2932_v38, %s5716_s27  ;;  %3085 = vrot.lane.b32.xlu0 %v2930_v20, %s5716_s27  ;;  %s6561_s27 = smov 126  }
 0x73a   : > { %3221 = vrot.lane.b32.xlu1 %v2931_v41, %s5719_s16  ;;  %3223 = vrot.lane.b32.xlu0 %v2932_v38, %s5719_s16 }
 0x73e   : > { %3219 = vrot.lane.b32.xlu1 %v2930_v20, %s5719_s16  ;;  %3367 = vrot.lane.b32.xlu0 %v2931_v41, %s5721_s22 }
 0x742   : > { %3369 = vrot.lane.b32.xlu1 %v2932_v38, %s5721_s22  ;;  %3365 = vrot.lane.b32.xlu0 %v2930_v20, %s5721_s22 }
 0x746   : > { %3514 = vrot.lane.b32.xlu1 %v2931_v41, %s5722_s23  ;;  %3516 = vrot.lane.b32.xlu0 %v2932_v38, %s5722_s23 }
 0x74a   : > { %3512 = vrot.lane.b32.xlu1 %v2930_v20, %s5722_s23  ;;  %3661 = vperm.xlu0 %5501, %v5020_v45  }
 0x74e   : > { %3666 = vperm.xlu1 %5502, %v5021_v21   ;;  %3651 = vperm.xlu0 %5501, %v5018_v23  }
 0x752   : > { %3656 = vperm.xlu1 %5502, %v5019_v25   ;;  %3744 = vperm.xlu0 %5501, %v5032_v26  }
 0x756   : > { %3749 = vperm.xlu1 %5502, %v5033_v27  }
 0x7a0   : > { %v2959_v33 = vpop.permute.xlu1 %2958  ;;  %v2961_v34 = vpop.permute.xlu0 %2960 }
 0x7a1   : > { %5243 = vmatprep.subr.bf16.mxu1 %v2961_v34  ;;  %v2963_v35 = vsel %vm2361_vm9, %v2959_v33, %v2961_v34 }
 0x7a2   : > { %2973 = vmatprep.subr.bf16.mxu0 %v2963_v35  ;;  %5244 = vmatpush3.bf16.msra.mxu1 %v2961_v34 }
 0x7a4   : > { %v2957_v39 = vpop.permute.xlu1 %2956  ;;  %v3088_v44 = vpop.permute.xlu0 %3087 }
 0x7a5   : > { %v2962_v46 = vsel %vm2361_vm9, %v2957_v39, %v2959_v33  ;;  %5246 = vmatmul.mubr.msk.bf16.vlgmr.msra.gmra.mrb[20].mxu1 %vm976_vm3, %v5529_v36 }
 0x7a6   : > { %2974 = vmatpush1.bf16.msra.mxu0 %v2962_v46  ;;  %5251 = vmatprep.mubr.msk.bf16.mxu1 %vm976_vm3, %v5530_v37 }
 0x7a8   : > { %v3090_v48 = vpop.permute.xlu1 %3089  ;;  %v3086_v49 = vpop.permute.xlu0 %3085 }
 0x7a9   : > { %v3091_v50 = vsel %vm1518_vm7, %v3086_v49, %v3088_v44  ;;  %4978 = vmatmul.mubr.msk.bf16.vlgmr.msra.gmra.mrb[36].mxu0 %vm976_vm3, %v6191_v4  ;;  %5249 = vmatprep.subr.bf16.mxu1 %v3090_v48  ;;  %v3092_v51 = vsel %vm1518_vm7, %v3088_v44, %v3090_v48 }
 0x7aa   : > { %3102 = vmatprep.subr.bf16.mxu0 %v3092_v51  ;;  %5250 = vmatpush3.bf16.msra.mxu1 %v3090_v48 }
 0x7ab   : > { %3103 = vmatpush1.bf16.msra.mxu0 %v3091_v50  ;;  %3015 = vmatprep.mubr.bf16.mxu0 %v5711_v1 }
 0x7ac   : > { %v3222_v56 = vpop.permute.xlu1 %3221  ;;  %v3224_v57 = vpop.permute.xlu0 %3223 }
 0x7ad   : > { %5255 = vmatprep.subr.bf16.mxu1 %v3224_v57  ;;  %v3226_v58 = vsel %vm2508_vm10, %v3222_v56, %v3224_v57 }
 0x7ae   : > { %3236 = vmatprep.subr.bf16.mxu0 %v3226_v58 }
 0x7b0   : > { %v3220_v60 = vpop.permute.xlu1 %3219  ;;  %v3368_v61 = vpop.permute.xlu0 %3367 }
 0x7b1   : > { %4979 = vmatmul.mubr.msk.bf16.gmra.mrb[40].mxu0 %vm976_vm3, %v5529_v36  ;;  %5252 = vmatmul.mubr.msk.bf16.vlgmr.msra.gmra.mrb[20].mxu1 %vm976_vm3, %v5531_v59  ;;  %v3225_v2 = vsel %vm2508_vm10, %v3220_v60, %v3222_v56 }
 0x7b2   : > { %5256 = vmatpush3.bf16.msra.mxu1 %v3224_v57  ;;  %3134 = vmatprep.mubr.bf16.mxu0 %v5711_v1 }
 0x7b3   : > { %5257 = vmatprep.mubr.msk.bf16.mxu1 %vm976_vm3, %v5532_v22 }
 0x7b4   : > { %v3370_v62 = vpop.permute.xlu1 %3369  ;;  %v3366_v63 = vpop.permute.xlu0 %3365 }
 0x7b5   : > { %5261 = vmatprep.subr.bf16.mxu1 %v3370_v62  ;;  %v3373_v4 = vsel %vm3371_vm11, %v3368_v61, %v3370_v62  ;;  %v3372_v10 = vsel %vm3371_vm11, %v3366_v63, %v3368_v61 }
 0x7b8   : > { %v3517_v6 = vpop.permute.xlu0 %3516  ;;  %v3515_v8 = vpop.permute.xlu1 %3514 }
 0x7b9   : > { %4984 = vmatmul.mubr.msk.bf16.vlgmr.msra.gmra.mrb[36].mxu0 %vm976_vm3, %v5530_v37  ;;  %v3520_v11 = vsel %vm3518_vm12, %v3515_v8, %v3517_v6 }
 0x7ba   : > { %3237 = vmatpush1.bf16.msra.mxu0 %v3225_v2  ;;  %3144 = vmatprep.mubr.bf16.mxu0 %v5711_v1 }
 0x7bb   : > { %3383 = vmatprep.subr.bf16.mxu0 %v3373_v4 }
 0x7bc   : > { %v3513_v13 = vpop.permute.xlu1 %3512 }
 0x7bd   : > { %5258 = vmatmul.mubr.msk.bf16.vlgmr.msra.gmra.mrb[20].mxu1 %vm976_vm3, %v5533_v3  ;;  %v3519_v42 = vsel %vm3518_vm12, %v3513_v13, %v3515_v8 }
 0x7be   : > { %5262 = vmatpush3.bf16.msra.mxu1 %v3370_v62  ;;  %5263 = vmatprep.mubr.msk.bf16.mxu1 %vm976_vm3, %v5534_v5 }
 0x7bf   : > { %5267 = vmatprep.subr.bf16.mxu1 %v3517_v6 }
 0x7c1   : > { %4985 = vmatmul.mubr.msk.bf16.gmra.mrb[40].mxu0 %vm976_vm3, %v5531_v59 }
 0x7c2   : > { %3268 = vmatprep.mubr.bf16.mxu0 %v5711_v1 }
 0x7c9   : > { %4994 = vmatmul.mubr.msk.bf16.vlgmr.msra.gmra.mrb[36].mxu0 %vm976_vm3, %v5532_v22  ;;  %5264 = vmatmul.mubr.msk.bf16.vlgmr.msra.gmra.mrb[20].mxu1 %vm976_vm3, %v5535_v7  ;;  %v3662_v16 = vpop.permute.xlu0 %3661 }
 0x7ca   : > { %3384 = vmatpush1.bf16.msra.mxu0 %v3372_v10  ;;  %5268 = vmatpush3.bf16.msra.mxu1 %v3517_v6 }
 0x7cb   : > { %3530 = vmatprep.subr.bf16.mxu0 %v3520_v11  ;;  %3278 = vmatprep.mubr.bf16.mxu0 %v5711_v1 }
 0x7cc   : > { %5269 = vmatprep.mubr.msk.bf16.mxu1 %vm976_vm3, %v5536_v9 }
 0x7cd   : > { %v3667_v20 = vpop.permute.xlu1 %3666  ;;  %v3652_v27 = vpop.permute.xlu0 %3651 }
 0x7d1   : > { %4995 = vmatmul.mubr.msk.bf16.gmra.mrb[40].mxu0 %vm976_vm3, %v5533_v3  ;;  %v3657_v34 = vpop.permute.xlu1 %3656 }
 0x7d2   : > { %3415 = vmatprep.mubr.bf16.mxu0 %v5711_v1 }
 0x7d5   : > { %5270 = vmatmul.mubr.msk.bf16.vlgmr.msra.gmra.mrb[20].mxu1 %vm976_vm3, %v5537_v12 }
 0x7d6   : > { %3810 = vmatprep.mubr.bf16.mxu1 %v5711_v1 }
 0x7d9   : > { %5004 = vmatmul.mubr.msk.bf16.vlgmr.msra.gmra.mrb[36].mxu0 %vm976_vm3, %v5534_v5 }
 0x7da   : > { %3531 = vmatpush1.bf16.msra.mxu0 %v3519_v42  ;;  %3425 = vmatprep.mubr.bf16.mxu0 %v5711_v1 }
 0x7e1   : > { %5005 = vmatmul.mubr.msk.bf16.gmra.mrb[40].mxu0 %vm976_vm3, %v5535_v7 }
 0x7e2   : > { %3562 = vmatprep.mubr.bf16.mxu0 %v5711_v1 }
 0x7e9   : > { %5014 = vmatmul.mubr.msk.bf16.vlgmr.msra.gmra.mrb[36].mxu0 %vm976_vm3, %v5536_v9 }
 0x7ea   : > { %3572 = vmatprep.mubr.bf16.mxu0 %v5711_v1 }
 0x7f1   : > { %5015 = vmatmul.mubr.msk.bf16.gmra.mrb[40].mxu0 %vm976_vm3, %v5537_v12 }
 0x7f2   : > { %4536 = vmatprep.mubr.bf16.mxu0 %v5711_v1 }
 0x8a8   : > { %v5271_v17 = vpop.f32.mrb[20].mxu1 }
 0x8a9   : > { %v3677_v41 = vadd.f32 %v5271_v17, %v3662_v16  ;;  %v3617_v38 = vpop.f32.mrb[21].mxu1 }
 0x8aa   : > { %v5272_v45 = vpop.f32.mrb[22].mxu1  ;;  %v3671_v33 = vadd.f32 %v3652_v27, %v3617_v38 }
 0x8ab   : > { %v5024_v21 = vmul.f32 -1.442695, %v3677_v41  ;;  %v3680_v23 = vadd.f32 %v5272_v45, %v3667_v20  ;;  %v3620_v25 = vpop.f32.mrb[23].mxu1 }
 0x8ac   : > { %v3674_v36 = vadd.f32 %v3657_v34, %v3620_v25 }
 0x8ad   : > { %5624 = vpow2.f32 %v5024_v21  ;;  %v5027_v26 = vmul.f32 -1.442695, %v3680_v23 }
 0x8af   : > { %5626 = vpow2.f32 %v5027_v26 }
 0x8b0   : > { %5628 = vtanh.f32 %v3671_v33 }
 0x8b7   : > { %v5625_v35 = vpop.eup %5624 }
 0x8b8   : > { %v3707_v37 = vadd.f32 1.0, %v5625_v35 }
 0x8b9   : > { %v5627_v39 = vpop.eup %5626 }
 0x8ba   : > { %5630 = vrcp.f32 %v3707_v37  ;;  %v3710_v44 = vadd.f32 1.0, %v5627_v39  ;;  %v5629_v51 = vpop.eup %5628 }
 0x8bb   : > { %5632 = vtanh.f32 %v3674_v36 }
 0x8bc   : > { %5634 = vrcp.f32 %v3710_v44  ;;  %v3564_v46 = vpop.f32.mrb[36].mxu0 }
 0x8bd   : > { %v3566_v48 = vpop.f32.mrb[37].mxu0  ;;  %v3669_v11 = vadd.f32 %v3652_v27, %v3564_v46 }
 0x8be   : > { %v3568_v49 = vpop.f32.mrb[38].mxu0  ;;  %v3670_v12 = vadd.f32 %v3652_v27, %v3566_v48 }
 0x8bf   : > { %v3570_v50 = vpop.f32.mrb[39].mxu0  ;;  %v3672_v13 = vadd.f32 %v3657_v34, %v3568_v49 }
 0x8c0   : > { %v3673_v42 = vadd.f32 %v3657_v34, %v3570_v50 }
 0x8c4   : > { %v5631_v56 = vpop.eup %5630  ;;  %v3574_v57 = vpop.f32.mrb[40].mxu0 }
 0x8c5   : > { %v5633_v58 = vpop.eup %5632  ;;  %v3675_v59 = vadd.f32 %v3662_v16, %v3574_v57  ;;  %v3576_v22 = vpop.f32.mrb[41].mxu0  ;;  %v3725_v60 = vmul.f32 %v5631_v56, %v5629_v51  ;;  %v5538_v51 = vld [vmem:[%s6546_s11 + $0x20] sm:$0xff]   ;;  %v5539_v56 = vld [vmem:[%s6546_s11 + $0x28] sm:$0xff]  }
 0x8c6   : > { %v5635_v61 = vpop.eup %5634  ;;  %v3676_v62 = vadd.f32 %v3662_v16, %v3576_v22  ;;  %v3578_v63 = vpop.f32.mrb[42].mxu0 }
 0x8c7   : > { %v5022_v2 = vmul.f32 -1.442695, %v3675_v59  ;;  %v3678_v3 = vadd.f32 %v3667_v20, %v3578_v63  ;;  %v3580_v4 = vpop.f32.mrb[43].mxu0  ;;  %v3728_v5 = vmul.f32 %v5635_v61, %v5633_v58  ;;  %v3745_v57 = vpop.permute.xlu0 %3744 }
 0x8c8   : > { %v5023_v6 = vmul.f32 -1.442695, %v3676_v62  ;;  %v3679_v7 = vadd.f32 %v3667_v20, %v3580_v4  ;;  %v3750_v63 = vpop.permute.xlu1 %3749 }
 0x8c9   : > { %5636 = vpow2.f32 %v5022_v2  ;;  %v5025_v8 = vmul.f32 -1.442695, %v3678_v3  ;;  %v3736_v9 = vpack.c.bf16 %v3728_v5, %v3725_v60 }
 0x8ca   : > { %5638 = vpow2.f32 %v5023_v6  ;;  %v5026_v10 = vmul.f32 -1.442695, %v3679_v7 }
 0x8cb   : > { %5640 = vpow2.f32 %v5025_v8 }
 0x8cc   : > { %5642 = vpow2.f32 %v5026_v10 }
 0x8cd   : > { %5644 = vtanh.f32 %v3669_v11 }
 0x8ce   : > { %5646 = vtanh.f32 %v3670_v12 }
 0x8cf   : > { %5648 = vtanh.f32 %v3672_v13 }
 0x8d0   : > { %5650 = vtanh.f32 %v3673_v42 }
 0x8d3   : > { %v5637_v16 = vpop.eup %5636 }
 0x8d4   : > { %v5639_v17 = vpop.eup %5638  ;;  %v3705_v41 = vadd.f32 1.0, %v5637_v16 }
 0x8d5   : > { %v5641_v38 = vpop.eup %5640  ;;  %v3706_v20 = vadd.f32 1.0, %v5639_v17 }
 0x8d6   : > { %v5643_v45 = vpop.eup %5642  ;;  %5652 = vrcp.f32 %v3705_v41  ;;  %v3708_v21 = vadd.f32 1.0, %v5641_v38 }
 0x8d7   : > { %5654 = vrcp.f32 %v3706_v20  ;;  %v3709_v23 = vadd.f32 1.0, %v5643_v45  ;;  %v5645_v25 = vpop.eup %5644 }
 0x8d8   : > { %5656 = vrcp.f32 %v3708_v21  ;;  %v5647_v26 = vpop.eup %5646 }
 0x8d9   : > { %5658 = vrcp.f32 %v3709_v23  ;;  %v5649_v27 = vpop.eup %5648 }
 0x8da   : > { %v5651_v33 = vpop.eup %5650 }
 0x8e0   : > { %v5653_v34 = vpop.eup %5652 }
 0x8e1   : > { %v5655_v35 = vpop.eup %5654  ;;  %v3723_v36 = vmul.f32 %v5653_v34, %v5645_v25 }
 0x8e2   : > { %v5657_v37 = vpop.eup %5656  ;;  %v3724_v39 = vmul.f32 %v5655_v35, %v5647_v26 }
 0x8e3   : > { %v5659_v44 = vpop.eup %5658  ;;  %v3726_v46 = vmul.f32 %v5657_v37, %v5649_v27 }
 0x8e4   : > { %v3727_v48 = vmul.f32 %v5659_v44, %v5651_v33 }
 0x8e5   : > { %v3734_v49 = vpack.c.bf16 %v3726_v46, %v3723_v36 }
 0x8e6   : > { %v3735_v50 = vpack.c.bf16 %v3727_v48, %v3724_v39 }
 0x8e8   : > { %3778 = vmatprep.subr.bf16.mxu1 %v3735_v50  ;;  %v5034_v50 = vld [vmem:[%s6547_s12 + $0x50] sm:$0xff] }
 0x8e9   : > { %3779 = vmatpush1.bf16.msra.mxu1 %v3734_v49  ;;  %v5083_v49 = vld [vmem:[%s5920_s25 + $0x68] sm:$0xff] }
 0x8ea   : > { %5273 = vmatprep.subr.bf16.mxu1 %v3736_v9 }
 0x8ec   : > { %5038 = vmatmul.mubr.msk.bf16.vlgmr.msra.gmra.mrb[24].mxu1 %vm976_vm3, %v5538_v51 }
 0x8ed   : > { %5274 = vmatpush3.bf16.msra.mxu1 %v3736_v9  ;;  %3820 = vmatprep.mubr.bf16.mxu1 %v5711_v1 }
 0x8f4   : > { %5039 = vmatmul.mubr.msk.bf16.gmra.mrb[28].mxu1 %vm976_vm3, %v5539_v56 }
 0x8f5   : > { %5275 = vmatprep.mubr.msk.bf16.mxu1 %vm976_vm3, %v5538_v51  ;;  %v4961_v51 = vld [vmem:[%s6547_s12 + $0x38] sm:$0xff] }
 0x8fc   : > { %5276 = vmatmul.mubr.msk.bf16.vlgmr.msra.gmra.mrb[32].mxu1 %vm976_vm3, %v5539_v56  ;;  %v5096_v56 = vld [vmem:[%s6547_s12 + $0x70] sm:$0xff] }
 0x8fd   : > { %4015 = vmatprep.mubr.bf16.mxu1 %v5711_v1 }
 0x9bf   : > { %v3812_v58 = vpop.f32.mrb[24].mxu1 }
 0x9c0   : > { %v3813_v59 = vadd.f32 %v3812_v58, %v3745_v57  ;;  %v3814_v22 = vpop.f32.mrb[25].mxu1  ;;  %v1737_v58 = vld [vmem:[%s6547_s12 + $0x10] sm:$0xff] }
 0x9c1   : > { %v3815_v60 = vadd.f32 %v3814_v22, %v3745_v57  ;;  %v3816_v61 = vpop.f32.mrb[26].mxu1  ;;  %v1738_v22 = vld [vmem:[%s6547_s12 + $0x18] sm:$0xff] }
 0x9c2   : > { %v3818_v62 = vpop.f32.mrb[27].mxu1  ;;  %3906 = vrot.lane.b32.xlu0 %v3813_v59, %s6556_s30  ;;  %v3817_v2 = vadd.f32 %v3816_v61, %v3750_v63  ;;  %v5097_v59 = vld [vmem:[%s6547_s12 + $0x78] sm:$0xff] }
 0x9c3   : > { %3908 = vrot.lane.b32.xlu1 %v3815_v60, %s6556_s30  ;;  %v3819_v13 = vadd.f32 %v3818_v62, %v3750_v63 }
 0x9c7   : > { %v6339_v3 = vpop.f32.mrb[28].mxu1  ;;  %3912 = vrot.lane.b32.xlu1 %v3817_v2, %s6556_s30 }
 0x9c8   : > { %v6342_v4 = vpop.f32.mrb[29].mxu1 }
 0x9c9   : > { %v6344_v5 = vpop.f32.mrb[30].mxu1 }
 0x9ca   : > { %v6346_v6 = vpop.f32.mrb[31].mxu1 }
 0x9cf   : > { %v5277_v7 = vpop.f32.mrb[32].mxu1 }
 0x9d0   : > { %v3865_v8 = vpop.f32.mrb[33].mxu1 }
 0x9d1   : > { %v3866_v9 = vadd.f32 %v3865_v8, %v3745_v57  ;;  %v5278_v10 = vpop.f32.mrb[34].mxu1  ;;  %v5035_v57 = vld [vmem:[%s6547_s12 + $0x58] sm:$0xff]  ;;  %v5540_v8 = vld [vmem:[%s6545_s10 + $0x100] sm:$0xff]  }
 0x9d2   : > { %v3868_v11 = vpop.f32.mrb[35].mxu1 }
 0x9d3   : > { %v3869_v12 = vadd.f32 %v3868_v11, %v3750_v63  ;;  %3910 = vrot.lane.b32.xlu0 %v3866_v9, %s6556_s30 }
 0x9d5   : > { %3916 = vrot.lane.b32.xlu1 %v3869_v12, %s6556_s30 }
 0x9d7   : > { %3914 = vrot.lane.b32.xlu0 %v3819_v13, %s6556_s30 }
 0xa34   : > { %v3907_v16 = vpop.permute.xlu0 %3906 }
 0xa35   : > { %v3909_v42 = vpop.permute.xlu1 %3908  ;;  %v3929_v36 = vadd.f32 %v3907_v16, %v6228_v30  ;;  %v4960_v30 = vld [vmem:[%s6547_s12 + $0x30] sm:$0xff] }
 0xa36   : > { %v3919_v38 = vsel %vm3918_vm13, %v3907_v16, %v3909_v42 }
 0xa37   : > { %v3930_v45 = vadd.f32 %v3919_v38, %v6209_v14  ;;  %v5542_v38 = vld [vmem:[%s6545_s10 + $0xf0] sm:$0xff]  }
 0xa39   : > { %v3913_v17 = vpop.permute.xlu1 %3912  ;;  %v3936_v37 = vmul.f32 %v6206_v43, %v3930_v45 }
 0xa3a   : > { %v3932_v33 = vadd.f32 %v3913_v17, %v6221_v15  ;;  %v3935_v15 = vmul.f32 %v3929_v36, %v5873_v24 }
 0xa3c   : > { %v3938_v44 = vmul.f32 %v3932_v33, %v5873_v24  ;;  %v5084_v24 = vld [vmem:[%s5920_s25 + $0x70] sm:$0xff] }
 0xa45   : > { %v3911_v41 = vpop.permute.xlu0 %3910 }
 0xa46   : > { %v3920_v20 = vsel %vm3918_vm13, %v3909_v42, %v3911_v41 }
 0xa47   : > { %v3931_v21 = vadd.f32 %v3920_v20, %v6212_v47  ;;  %v3917_v23 = vpop.permute.xlu1 %3916 }
 0xa49   : > { %v3915_v25 = vpop.permute.xlu0 %3914  ;;  %v3937_v14 = vmul.f32 %v3931_v21, %v5886_v40 }
 0xa4a   : > { %v3921_v26 = vsel %vm3918_vm13, %v3913_v17, %v3915_v25  ;;  %v3922_v27 = vsel %vm3918_vm13, %v3915_v25, %v3917_v23  ;;  %v5541_v17 = vld [vmem:[%s6545_s10 + $0x108] sm:$0xff]   ;;  %v5543_v25 = vld [vmem:[%s6545_s10 + $0xf8] sm:$0xff]  }
 0xa4b   : > { %v3933_v34 = vadd.f32 %v3921_v26, %v6215_v18  ;;  %v3934_v35 = vadd.f32 %v3922_v27, %v6218_v19  ;;  %v3941_v18 = vpack.c.bf16 %v3938_v44, %v3935_v15  ;;  %v5085_v19 = vld [vmem:[%s5920_s25 + $0x78] sm:$0xff] }
 0xa4c   : > { %v5545_v44 = vld [vmem:[%s6545_s10 + $0x118] sm:$0xff]  }
 0xa4d   : > { %v3939_v47 = vmul.f32 %v6206_v43, %v3933_v34  ;;  %v3940_v39 = vmul.f32 %v3934_v35, %v5886_v40  ;;  %v5082_v40 = vld [vmem:[%s5920_s25 + $0x60] sm:$0xff]  ;;  %v5544_v34 = vld [vmem:[%s6545_s10 + $0x110] sm:$0xff]  }
 0xa4f   : > { %v3942_v46 = vpack.c.bf16 %v3939_v47, %v3936_v37  ;;  %v3943_v48 = vpack.c.bf16 %v3940_v39, %v3937_v14 }
 0xa51   : > { %3971 = vrot.lane.b32.xlu1 %v3943_v48, %s5721_s22  ;;  %3969 = vrot.lane.b32.xlu0 %v3942_v46, %s5721_s22 }
 0xa55   : > { %4048 = vrot.lane.b32.xlu1 %v3942_v46, %s5719_s16  ;;  %3967 = vrot.lane.b32.xlu0 %v3941_v18, %s5721_s22  ;;  %s6559_s22 = smov 4  }
 0xa59   : > { %4046 = vrot.lane.b32.xlu1 %v3941_v18, %s5719_s16  ;;  %4050 = vrot.lane.b32.xlu0 %v3943_v48, %s5719_s16 }
 0xa5d   : > { %4134 = vrot.lane.b32.xlu1 %v3943_v48, %s5722_s23  ;;  %4132 = vrot.lane.b32.xlu0 %v3942_v46, %s5722_s23 }
 0xa61   : > { %4224 = vrot.lane.b32.xlu1 %v3942_v46, %s5724_s28  ;;  %4130 = vrot.lane.b32.xlu0 %v3941_v18, %s5722_s23 }
 0xa65   : > { %4222 = vrot.lane.b32.xlu1 %v3941_v18, %s5724_s28  ;;  %4226 = vrot.lane.b32.xlu0 %v3943_v48, %s5724_s28 }
 0xa69   : > { %4319 = vrot.lane.b32.xlu1 %v3943_v48, %s5725_s29  ;;  %4317 = vrot.lane.b32.xlu0 %v3942_v46, %s5725_s29 }
 0xa6d   : > { %4410 = vperm.xlu1 %5502, %v5084_v24   ;;  %4315 = vrot.lane.b32.xlu0 %v3941_v18, %s5725_s29  ;;  %s6558_s29 = smov 2  }
 0xa71   : > { %4400 = vperm.xlu1 %5502, %v5082_v40   ;;  %4415 = vperm.xlu0 %5501, %v5085_v19   ;;  %v5546_v40 = vld [vmem:[%s6545_s10 + $0x120] sm:$0xff]  }
 0xa75   : > { %2744 = vperm.xlu1 %5502, %v4960_v30   ;;  %4405 = vperm.xlu0 %5501, %v5083_v49  }
 0xa79   : > { %3754 = vperm.xlu1 %5502, %v5034_v50   ;;  %2749 = vperm.xlu0 %5501, %v4961_v51  }
 0xa7d   : > { %4480 = vperm.xlu1 %5502, %v5096_v56   ;;  %3759 = vperm.xlu0 %5501, %v5035_v57  }
 0xa81   : > { %1751 = vperm.xlu1 %5502, %v1737_v58   ;;  %4485 = vperm.xlu0 %5501, %v5097_v59  }
 0xa85   : > { %1756 = vperm.xlu0 %5501, %v1738_v22  }
 0xac3   : > { %v3972_v60 = vpop.permute.xlu1 %3971  ;;  %v3970_v61 = vpop.permute.xlu0 %3969 }
 0xac4   : > { %v3974_v62 = vsel %vm3371_vm11, %v3970_v61, %v3972_v60 }
 0xac5   : > { %3983 = vmatprep.subr.bf16.mxu1 %v3974_v62 }
 0xac7   : > { %v4049_v63 = vpop.permute.xlu1 %4048  ;;  %v3968_v2 = vpop.permute.xlu0 %3967 }
 0xac8   : > { %v3973_v7 = vsel %vm3371_vm11, %v3968_v2, %v3970_v61 }
 0xac9   : > { %3984 = vmatpush1.bf16.msra.mxu1 %v3973_v7 }
 0xacb   : > { %v4047_v9 = vpop.permute.xlu1 %4046  ;;  %v4051_v10 = vpop.permute.xlu0 %4050 }
 0xacc   : > { %v4052_v11 = vsel %vm2508_vm10, %v4047_v9, %v4049_v63  ;;  %5052 = vmatmul.mubr.msk.bf16.vlgmr.msra.gmra.mrb[36].mxu1 %vm976_vm3, %v5540_v8  ;;  %v4053_v12 = vsel %vm2508_vm10, %v4049_v63, %v4051_v10 }
 0xacd   : > { %4062 = vmatprep.subr.bf16.mxu1 %v4053_v12  ;;  %4025 = vmatprep.mubr.bf16.mxu1 %v5711_v1 }
 0xace   : > { %4063 = vmatpush1.bf16.msra.mxu1 %v4052_v11 }
 0xacf   : > { %v4135_v13 = vpop.permute.xlu1 %4134  ;;  %v4133_v42 = vpop.permute.xlu0 %4132 }
 0xad0   : > { %v4137_v16 = vsel %vm3518_vm12, %v4133_v42, %v4135_v13 }
 0xad1   : > { %4146 = vmatprep.subr.bf16.mxu1 %v4137_v16 }
 0xad3   : > { %v4131_v41 = vpop.permute.xlu0 %4130  ;;  %v4225_v45 = vpop.permute.xlu1 %4224 }
 0xad4   : > { %5053 = vmatmul.mubr.msk.bf16.gmra.mrb[40].mxu1 %vm976_vm3, %v5541_v17  ;;  %v4136_v21 = vsel %vm3518_vm12, %v4131_v41, %v4133_v42 }
 0xad5   : > { %4094 = vmatprep.mubr.bf16.mxu1 %v5711_v1 }
 0xad7   : > { %v4227_v20 = vpop.permute.xlu0 %4226  ;;  %v4223_v26 = vpop.permute.xlu1 %4222 }
 0xad8   : > { %v4230_v23 = vsel %vm4228_vm14, %v4225_v45, %v4227_v20  ;;  %v4229_v35 = vsel %vm4228_vm14, %v4223_v26, %v4225_v45 }
 0xadb   : > { %v4318_v27 = vpop.permute.xlu0 %4317  ;;  %v4320_v33 = vpop.permute.xlu1 %4319 }
 0xadc   : > { %5056 = vmatmul.mubr.msk.bf16.vlgmr.msra.gmra.mrb[36].mxu1 %vm976_vm3, %v5542_v38  ;;  %v4323_v14 = vsel %vm4321_vm15, %v4318_v27, %v4320_v33 }
 0xadd   : > { %4147 = vmatpush1.bf16.msra.mxu1 %v4136_v21  ;;  %4104 = vmatprep.mubr.bf16.mxu1 %v5711_v1 }
 0xade   : > { %4239 = vmatprep.subr.bf16.mxu1 %v4230_v23 }
 0xadf   : > { %v4316_v36 = vpop.permute.xlu0 %4315 }
 0xae4   : > { %5057 = vmatmul.mubr.msk.bf16.gmra.mrb[40].mxu1 %vm976_vm3, %v5543_v25 }
 0xae5   : > { %4178 = vmatprep.mubr.bf16.mxu1 %v5711_v1 }
 0xaec   : > { %v4411_v37 = vpop.permute.xlu1 %4410  ;;  %5064 = vmatmul.mubr.msk.bf16.vlgmr.msra.gmra.mrb[36].mxu1 %vm976_vm3, %v5544_v34 }
 0xaed   : > { %4240 = vmatpush1.bf16.msra.mxu1 %v4229_v35  ;;  %4188 = vmatprep.mubr.bf16.mxu1 %v5711_v1 }
 0xaee   : > { %4332 = vmatprep.subr.bf16.mxu1 %v4323_v14 }
 0xaf0   : > { %v4401_v47 = vpop.permute.xlu1 %4400  ;;  %v4416_v39 = vpop.permute.xlu0 %4415 }
 0xaf4   : > { %v2745_v46 = vpop.permute.xlu1 %2744  ;;  %5065 = vmatmul.mubr.msk.bf16.gmra.mrb[40].mxu1 %vm976_vm3, %v5545_v44  ;;  %v4406_v48 = vpop.permute.xlu0 %4405 }
 0xaf5   : > { %v2813_v15 = vadd.f32 %v6176_v52, %v2745_v46  ;;  %v2815_v18 = vadd.f32 %v6179_v53, %v2745_v46  ;;  %4271 = vmatprep.mubr.bf16.mxu1 %v5711_v1  ;;  %v4322_v52 = vsel %vm4321_vm15, %v4316_v36, %v4318_v27 }
 0xaf7   : > { %2872 = vrot.lane.b32.xlu1 %v2813_v15, %s6558_s29  ;;  %2874 = vrot.lane.b32.xlu0 %v2815_v18, %s6558_s29  ;;  %v5550_v18 = vld [vmem:[%s6546_s11 + $0x30] sm:$0xff]  }
 0xaf8   : > { %v2750_v24 = vpop.permute.xlu0 %2749  ;;  %v3755_v49 = vpop.permute.xlu1 %3754 }
 0xaf9   : > { %v2817_v19 = vadd.f32 %v6181_v54, %v2750_v24  ;;  %v2819_v30 = vadd.f32 %v6183_v55, %v2750_v24  ;;  %v3823_v53 = vadd.f32 %v6339_v3, %v3755_v49  ;;  %v3825_v50 = vadd.f32 %v6342_v4, %v3755_v49  ;;  %v5547_v54 = vld [vmem:[%s6545_s10 + $0x128] sm:$0xff]   ;;  %v5548_v3 = vld [vmem:[%s6545_s10 + $0x130] sm:$0xff]   ;;  %v5549_v4 = vld [vmem:[%s6545_s10 + $0x138] sm:$0xff]  }
 0xafa   : > { %v5551_v24 = vld [vmem:[%s6546_s11 + $0x38] sm:$0xff]  }
 0xafb   : > { %2878 = vrot.lane.b32.xlu0 %v2819_v30, %s6558_s29  ;;  %2876 = vrot.lane.b32.xlu1 %v2817_v19, %s6558_s29 }
 0xafc   : > { %5072 = vmatmul.mubr.msk.bf16.vlgmr.msra.gmra.mrb[36].mxu1 %vm976_vm3, %v5546_v40  ;;  %v3760_v51 = vpop.permute.xlu0 %3759 }
 0xafd   : > { %4333 = vmatpush1.bf16.msra.mxu1 %v4322_v52  ;;  %4281 = vmatprep.mubr.bf16.mxu1 %v5711_v1  ;;  %v3827_v55 = vadd.f32 %v6344_v5, %v3760_v51  ;;  %v3829_v56 = vadd.f32 %v6346_v6, %v3760_v51  ;;  %v4481_v52 = vpop.permute.xlu1 %4480 }
 0xaff   : > { %3884 = vrot.lane.b32.xlu0 %v3825_v50, %s6559_s22  ;;  %3882 = vrot.lane.b32.xlu1 %v3823_v53, %s6559_s22 }
 0xb03   : > { %3888 = vrot.lane.b32.xlu0 %v3829_v56, %s6559_s22  ;;  %3886 = vrot.lane.b32.xlu1 %v3827_v55, %s6559_s22  ;;  %v4486_v56 = vpop.permute.xlu0 %4485  ;;  %s771_s22 = scalar_lea.vmem %s6541_s6, %s5836_s24 }
 0xb04   : > { %5073 = vmatmul.mubr.msk.bf16.gmra.mrb[40].mxu1 %vm976_vm3, %v5547_v54 }
 0xb05   : > { %4364 = vmatprep.mubr.bf16.mxu1 %v5711_v1 }
 0xb0c   : > { %5080 = vmatmul.mubr.msk.bf16.vlgmr.msra.gmra.mrb[36].mxu1 %vm976_vm3, %v5548_v3 }
 0xb0d   : > { %4374 = vmatprep.mubr.bf16.mxu1 %v5711_v1 }
 0xb14   : > { %5081 = vmatmul.mubr.msk.bf16.gmra.mrb[40].mxu1 %vm976_vm3, %v5549_v4 }
 0xbdf   : > { %v4366_v5 = vpop.f32.mrb[36].mxu1 }
 0xbe0   : > { %v4368_v6 = vpop.f32.mrb[37].mxu1  ;;  %v4418_v12 = vadd.f32 %v4401_v47, %v4366_v5  ;;  %v1757_v5 = vpop.permute.xlu0 %1756 }
 0xbe1   : > { %v4370_v57 = vpop.f32.mrb[38].mxu1  ;;  %v4419_v13 = vadd.f32 %v4401_v47, %v4368_v6 }
 0xbe2   : > { %v4372_v58 = vpop.f32.mrb[39].mxu1  ;;  %v4420_v42 = vadd.f32 %v4406_v48, %v4370_v57 }
 0xbe3   : > { %v4421_v16 = vadd.f32 %v4406_v48, %v4372_v58 }
 0xbe4   : > { %v2875_v57 = vpop.permute.xlu0 %2874 }
 0xbe7   : > { %v4376_v59 = vpop.f32.mrb[40].mxu1 }
 0xbe8   : > { %v4422_v22 = vadd.f32 %v4411_v37, %v4376_v59  ;;  %v4378_v60 = vpop.f32.mrb[41].mxu1  ;;  %v2879_v59 = vpop.permute.xlu0 %2878 }
 0xbe9   : > { %v4423_v61 = vadd.f32 %v4411_v37, %v4378_v60  ;;  %v4380_v62 = vpop.f32.mrb[42].mxu1 }
 0xbea   : > { %v5086_v63 = vmul.f32 -1.442695, %v4422_v22  ;;  %v4424_v2 = vadd.f32 %v4416_v39, %v4380_v62  ;;  %v4382_v7 = vpop.f32.mrb[43].mxu1 }
 0xbeb   : > { %v5087_v8 = vmul.f32 -1.442695, %v4423_v61  ;;  %v4425_v9 = vadd.f32 %v4416_v39, %v4382_v7 }
 0xbec   : > { %5660 = vpow2.f32 %v5086_v63  ;;  %v5088_v10 = vmul.f32 -1.442695, %v4424_v2  ;;  %v3885_v60 = vpop.permute.xlu0 %3884 }
 0xbed   : > { %5662 = vpow2.f32 %v5087_v8  ;;  %v5089_v11 = vmul.f32 -1.442695, %v4425_v9 }
 0xbee   : > { %5664 = vpow2.f32 %v5088_v10  ;;  %v1826_v10 = vadd.f32 %v6093_v32, %v1757_v5 }
 0xbef   : > { %5666 = vpow2.f32 %v5089_v11 }
 0xbf0   : > { %5668 = vtanh.f32 %v4418_v12  ;;  %v3889_v62 = vpop.permute.xlu0 %3888 }
 0xbf1   : > { %5670 = vtanh.f32 %v4419_v13 }
 0xbf2   : > { %5672 = vtanh.f32 %v4420_v42 }
 0xbf3   : > { %5674 = vtanh.f32 %v4421_v16 }
 0xbf6   : > { %v5661_v17 = vpop.eup %5660 }
 0xbf7   : > { %v5663_v41 = vpop.eup %5662  ;;  %v4442_v38 = vadd.f32 1.0, %v5661_v17 }
 0xbf8   : > { %v5665_v20 = vpop.eup %5664  ;;  %v4443_v45 = vadd.f32 1.0, %v5663_v41 }
 0xbf9   : > { %v5667_v21 = vpop.eup %5666  ;;  %5676 = vrcp.f32 %v4442_v38  ;;  %v4444_v23 = vadd.f32 1.0, %v5665_v20 }
 0xbfa   : > { %5678 = vrcp.f32 %v4443_v45  ;;  %v4445_v25 = vadd.f32 1.0, %v5667_v21  ;;  %v5669_v26 = vpop.eup %5668 }
 0xbfb   : > { %5680 = vrcp.f32 %v4444_v23  ;;  %v5671_v27 = vpop.eup %5670 }
 0xbfc   : > { %5682 = vrcp.f32 %v4445_v25  ;;  %v5673_v33 = vpop.eup %5672 }
 0xbfd   : > { %v5675_v34 = vpop.eup %5674 }
 0xc03   : > { %v5677_v35 = vpop.eup %5676 }
 0xc04   : > { %v5679_v36 = vpop.eup %5678  ;;  %v4454_v37 = vmul.f32 %v5677_v35, %v5669_v26 }
 0xc05   : > { %v5681_v14 = vpop.eup %5680  ;;  %v4455_v47 = vmul.f32 %v5679_v36, %v5671_v27 }
 0xc06   : > { %v5683_v39 = vpop.eup %5682  ;;  %v4456_v44 = vmul.f32 %v5681_v14, %v5673_v33 }
 0xc07   : > { %v4457_v46 = vmul.f32 %v5683_v39, %v5675_v34  ;;  %v4590_v39 = vld [vmem:[%s6549_s14] sm:$0xf] }
 0xc08   : > { %v4463_v48 = vpack.c.bf16 %v4456_v44, %v4454_v37 }
 0xc09   : > { %v4464_v15 = vpack.c.bf16 %v4457_v46, %v4455_v47 }
 0xc0b   : > { %4504 = vmatprep.subr.bf16.mxu0 %v4464_v15  ;;  %v4587_v15 = vld [vmem:[%s6548_s13] sm:$0x3] }
 0xc0c   : > { %4505 = vmatpush1.bf16.msra.mxu0 %v4463_v48 }
 0xc0d   : > { %5279 = vmatprep.subr.bf16.mxu0 %v5710_v0 }
 0xc0f   : > { %5100 = vmatmul.mubr.msk.bf16.vlgmr.msra.gmra.mrb[44].mxu0 %vm976_vm3, %v5550_v18 }
 0xc10   : > { %4542 = vmatprep.mubr.bf16.mxu0 %v5711_v1 }
 0xc17   : > { %5101 = vmatmul.mubr.msk.bf16.gmra.mrb[48].mxu0 %vm976_vm3, %v5551_v24 }
 0xc18   : > { %5281 = vmatprep.mubr.msk.bf16.mxu0 %vm5712_vm0, %v5710_v0  ;;  %v1752_v0 = vpop.permute.xlu1 %1751 }
 0xc19   : > { %v1820_v8 = vadd.f32 %v6087_v28, %v1752_v0  ;;  %v1822_v9 = vadd.f32 %v6089_v29, %v1752_v0 }
 0xc1c   : > { %v2873_v6 = vpop.permute.xlu1 %2872 }
 0xc1d   : > { %v2880_v63 = vsel %vm1897_vm8, %v2873_v6, %v2875_v57  ;;  %v2886_v42 = vadd.f32 %v2873_v6, %v1820_v8 }
 0xc1e   : > { %v2887_v16 = vadd.f32 %v2880_v63, %v1822_v9 }
 0xc20   : > { %v2877_v58 = vpop.permute.xlu1 %2876 }
 0xc21   : > { %v2881_v2 = vsel %vm1897_vm8, %v2877_v58, %v2879_v59 }
 0xc22   : > { %v2889_v41 = vadd.f32 %v2881_v2, %v1826_v10 }
 0xc24   : > { %v3883_v22 = vpop.permute.xlu1 %3882 }
 0xc25   : > { %v3890_v12 = vsel %vm823_vm2, %v3883_v22, %v3885_v60  ;;  %v3896_v45 = vadd.f32 %v3883_v22, %v2886_v42 }
 0xc26   : > { %v3897_v28 = vadd.f32 %v3890_v12, %v2887_v16 }
 0xc28   : > { %v3887_v61 = vpop.permute.xlu1 %3886 }
 0xc29   : > { %v3891_v13 = vsel %vm823_vm2, %v3887_v61, %v3889_v62 }
 0xc2a   : > { %v3899_v29 = vadd.f32 %v3891_v13, %v2889_v41 }
 0xce2   : > { %v4538_v40 = vpop.f32.mrb[44].mxu0 }
 0xce3   : > { %v4539_v19 = vpop.f32.mrb[45].mxu0  ;;  %v4648_v40 = vld [vmem:[%s771_s22] sm:$0xf] }
 0xce4   : > { %v4540_v30 = vpop.f32.mrb[46].mxu0 }
 0xce5   : > { %v4541_v49 = vpop.f32.mrb[47].mxu0 }
 0xcea   : > { %v4544_v53 = vpop.f32.mrb[48].mxu0 }
 0xceb   : > { %v4545_v50 = vadd.f32 %v4544_v53, %v4481_v52  ;;  %v4546_v51 = vpop.f32.mrb[49].mxu0 }
 0xcec   : > { %v4547_v54 = vadd.f32 %v4546_v51, %v4481_v52  ;;  %v4548_v55 = vpop.f32.mrb[50].mxu0 }
 0xced   : > { %v4550_v1 = vpop.f32.mrb[51].mxu0  ;;  %4557 = vrot.lane.b32.xlu1 %v4545_v50, %s6560_s17  ;;  %v4549_v3 = vadd.f32 %v4548_v55, %v4486_v56  ;;  %v5685_v50 = vld [vmem:[%s5871_s26] ss:$0 sm:$0xff] }
 0xcee   : > { %4559 = vrot.lane.b32.xlu0 %v4547_v54, %s6560_s17  ;;  %v4551_v4 = vadd.f32 %v4550_v1, %v4486_v56 }
 0xcf1   : > { %4561 = vrot.lane.b32.xlu1 %v4549_v3, %s6560_s17 }
 0xcf2   : > { %4563 = vrot.lane.b32.xlu0 %v4551_v4, %s6560_s17 }
 0xcf5   : > { %4580 = vrot.lane.b32.xlu1 %v6206_v43, %s6561_s27  ;;  %v1824_v43 = vadd.f32 %v6091_v31, %v1757_v5  ;;  %s783_s27 = scalar_lea.vmem %s6550_s15, %s5836_s24 }
 0xcf7   : > { %v2888_v17 = vadd.f32 %v2877_v58, %v1824_v43 }
 0xcf9   : > { %v3898_v21 = vadd.f32 %v3887_v61, %v2888_v17 }
 0xd5f   : > { %v4558_v7 = vpop.permute.xlu1 %4557 }
 0xd60   : > { %v4560_v11 = vpop.permute.xlu0 %4559  ;;  %v4571_v32 = vadd.f32 %v4558_v7, %v3896_v45 }
 0xd61   : > { %v4565_v38 = vsel %vm3918_vm13, %v4558_v7, %v4560_v11 }
 0xd62   : > { %v4572_v25 = vadd.f32 %v4565_v38, %v3897_v28 }
 0xd63   : > { %v4562_v20 = vpop.permute.xlu1 %4561 }
 0xd64   : > { %v4564_v23 = vpop.permute.xlu0 %4563  ;;  %v4573_v26 = vadd.f32 %v4562_v20, %v3898_v21 }
 0xd65   : > { %v4566_v31 = vsel %vm3918_vm13, %v4562_v20, %v4564_v23 }
 0xd66   : > { %v4574_v27 = vadd.f32 %v4566_v31, %v3899_v29 }
 0xd67   : > { %v4581_v33 = vpop.permute.xlu1 %4580 }
 0xd68   : > { %v4583_v34 = vmul.f32 %v4581_v33, %v4571_v32  ;;  %v4584_v35 = vmul.f32 %v4581_v33, %v4572_v25  ;;  %v4585_v36 = vmul.f32 %v4581_v33, %v4573_v26  ;;  %v4586_v37 = vmul.f32 %v4581_v33, %v4574_v27 }
 0xd6a   : > { %v4588_v14 = vpack.c.bf16 %v4585_v36, %v4583_v34  ;;  %v4589_v47 = vpack.c.bf16 %v4586_v37, %v4584_v35 }
 0xd6c   : > { %4598 = vrot.lane.b32.xlu0 %v4588_v14, %s6558_s29  ;;  %4600 = vrot.lane.b32.xlu1 %v4589_v47, %s6558_s29 }
 0xd70   : > { %4593 = vperm.xlu0 %5501, %v4590_v39  }
 0xdde   : > { %v4601_v44 = vpop.permute.xlu1 %4600  ;;  %v4599_v46 = vpop.permute.xlu0 %4598 }
 0xddf   : > { %v4603_v48 = vsel %vm1897_vm8, %v4599_v46, %v4601_v44 }
 0xde0   : > { %5280 = vmatpush3.bf16.msra.mxu0 %v4603_v48 }
 0xde3   : > { %5282 = vmatmul.mubr.msk.bf16.vlgmr.msra.gmra.mrb[52].mxu0 %vm976_vm3, %v4587_v15 }
 0xdef   : > { %v4594_v18 = vpop.permute.xlu0 %4593 }
 0xeb6   : > { %v4642_v24 = vpop.f32.mrb[52].mxu0 }
 0xeb7   : > { %v4643_v19 = vadd.f32 %v4642_v24, %v4594_v18  ;;  %v5283_v30 = vpop.f32.mrb[53].mxu0 }
 0xeb8   : > { %v4645_v49 = vpop.f32.mrb[54].mxu0 }
 0xeb9   : > { %v4649_v52 = vadd.f32 %v4648_v40, %v4643_v19  ;;  %v5284_v53 = vpop.f32.mrb[55].mxu0 }
 0xebb   : > { %v4651_v51 = vmul.f32 %v5685_v50, %v4649_v52 }
 0xebd   : > { %4652 = vst [vmem:[%s783_s27] sm:$0xf] %v4651_v51 }
 0xebe PF: > { %s25_s20 = sadd.s32 1, %s5708_s20   ;;  %s6562_s18 = smov %s5704_s19 }
 0xebf   : > { %p22_p5 = scmp.ge.s32.totalorder %s25_s20, 4   ;;  %s6563_s19 = smov %s6565_s21 }
 0xec1   :  { %24 = sbr.rel (!%p22_p5) target bundleno = 2 (0x2), region = 159 }

</bundles_post_ra>
